<compile_context>
chip_gen: v5e
topology: v5e:2x2
jax: 0.10.0
libtpu: 0.0.40
codegen_flags: <defaults>
</compile_context>

<pallas_src>
import math

import jax
import jax.numpy as jnp
import numpy as np
from jax import lax
from jax.experimental import pallas as pl
from jax.experimental.pallas import tpu as pltpu

TEMPERATURE = 0.1
BIG_NEG = 1000000000000.0  # 1e12, same constant as the PyTorch module
EPS = 1e-12                # F.normalize default eps


def _ntxent_kernel(q_ref, k_ref, scale_ref, bias_ref, out_ref, cat_ref):
    q = q_ref[...].astype(jnp.float32)   # [ppb, B, D]
    k = k_ref[...].astype(jnp.float32)   # [ppb, B, D]
    ppb, B, D = q.shape
    inv_t = jnp.float32(1.0 / TEMPERATURE)
    inv_t2 = jnp.float32(1.0 / (TEMPERATURE * TEMPERATURE))

    # --- F.normalize(p=2, dim=1): x / max(||x||, eps) == x * rsqrt(max(||x||^2,
    #     eps^2)) for non-degenerate rows; rsqrt runs on the EUP slot. ---
    q_inv = lax.rsqrt(jnp.maximum(jnp.sum(q * q, axis=2, keepdims=True), EPS * EPS))
    k_inv = lax.rsqrt(jnp.maximum(jnp.sum(k * k, axis=2, keepdims=True), EPS * EPS))
    qn = q * q_inv
    kn = k * k_inv

    # --- targets: diag(qk) == diag(kq) == sum(qn*kn, dim=-1); only the sum over
    #     rows is needed for the scalar-algebra loss tail. ---
    pos_sum = jnp.sum(jnp.sum(qn * kn, axis=2, keepdims=True),
                      axis=1, keepdims=True)                       # [ppb, 1, 1]

    # --- stacked features written into the two sublane-aligned halves of a
    #     VMEM scratch (replaces a materialized jnp.concatenate). ---
    cat_ref[:, :B, :] = qn
    cat_ref[:, B:, :] = kn
    cat = cat_ref[...]                                             # [ppb, 2B, D]

    # --- one batched MXU matmul: sim[p] = cat[p] @ cat[p]^T, contracting over
    #     D on both operands (no XLU transpose of either operand). ---
    sim = jnp.einsum('pid,pjd->pij', cat, cat,
                     preferred_element_type=jnp.float32)           # [ppb, 2B, 2B]

    # Block layout of sim[p]:  [ qq  qk ]
    #                          [ kq  kk ]
    # Reference rows (order within a row is irrelevant for logsumexp):
    #   row i      (loss_a): [ qk[i,:]/T    | (qq[i,:] - e_i*BIG)/T ]
    #   row B + i  (loss_b): [ kq[i,:]/T^2  | (kk[i,:] - e_i*BIG)/T ]
    # Both the diagonal mask and the block-wise 1/T scaling are compile-time
    # constant, so they collapse into one affine transform:
    #   logits = sim * SCALE + BIAS
    # with SCALE = 1/T (1/T^2 on the bottom-left kq block) and
    #      BIAS  = -1e12/T on the main diagonal, 0 elsewhere.
    logits = sim * scale_ref[...] + bias_ref[...]                  # [ppb, 2B, 2B]

    # --- row-wise stable logsumexp over all 2B candidates ---
    m = jnp.max(logits, axis=2, keepdims=True)
    lse = m + jnp.log(jnp.sum(jnp.exp(logits - m), axis=2, keepdims=True))
    lse_sum = jnp.sum(lse, axis=1, keepdims=True)                  # [ppb, 1, 1]

    # mean over each branch's B rows then average the two branches
    # == mean over all 2B rows; sum of targets = sum(pos) * (1/T + 1/T^2).
    loss = (lse_sum - pos_sum * (inv_t + inv_t2)) / (2.0 * B)      # [ppb, 1, 1]

    # lane-dense store: broadcast each pair's scalar across the 128-lane row so
    # the writeback is an unmasked full-width vst.
    out_ref[...] = jnp.broadcast_to(loss, out_ref.shape)


def _scale_bias_constants(batch):
    two_b = 2 * batch
    scale = np.full((two_b, two_b), 1.0 / TEMPERATURE, dtype=np.float32)
    scale[batch:, :batch] = 1.0 / (TEMPERATURE * TEMPERATURE)   # kq block: /T twice
    bias = np.zeros((two_b, two_b), dtype=np.float32)
    np.fill_diagonal(bias, -BIG_NEG / TEMPERATURE)              # diag -inf mask
    return jnp.asarray(scale), jnp.asarray(bias)


def ntxent_loss_batched(q_pairs, k_pairs, pairs_per_step=8):
    """q_pairs, k_pairs: [num_pairs, batch, ndim] -> per-pair losses [num_pairs]."""
    P, B, D = q_pairs.shape
    ppb = math.gcd(P, pairs_per_step)          # pairs per grid step (divides P)
    scale, bias = _scale_bias_constants(B)
    out = pl.pallas_call(
        _ntxent_kernel,
        out_shape=jax.ShapeDtypeStruct((P, 1, 128), jnp.float32),
        grid_spec=pltpu.PrefetchScalarGridSpec(
            num_scalar_prefetch=0,
            grid=(P // ppb,),
            in_specs=[
                pl.BlockSpec((ppb, B, D), lambda s: (s, 0, 0)),
                pl.BlockSpec((ppb, B, D), lambda s: (s, 0, 0)),
                pl.BlockSpec((2 * B, 2 * B), lambda s: (0, 0)),
                pl.BlockSpec((2 * B, 2 * B), lambda s: (0, 0)),
            ],
            out_specs=pl.BlockSpec((ppb, 1, 128), lambda s: (s, 0, 0)),
            scratch_shapes=[pltpu.VMEM((ppb, 2 * B, D), jnp.float32)],
        ),
        compiler_params=pltpu.CompilerParams(
            dimension_semantics=("parallel",)),   # shard pair axis across v7x TCs
    )(q_pairs, k_pairs, scale, bias)
    return out[:, 0, 0]


def ntxent_loss(q_feat, k_feat):
    """Single (q, k) pair, [batch, ndim] each -> scalar loss (mean reduction)."""
    return ntxent_loss_batched(q_feat[None], k_feat[None])[0]


def _ntxent_ref(q, k):
    """Pure-JAX reference mirroring the PyTorch forward exactly."""
    qn = q / jnp.maximum(jnp.linalg.norm(q, axis=1, keepdims=True), EPS)
    kn = k / jnp.maximum(jnp.linalg.norm(k, axis=1, keepdims=True), EPS)
    B = q.shape[0]
    eye = jnp.eye(B, dtype=jnp.float32)
    logits_aa = (qn @ qn.T - eye * BIG_NEG) / TEMPERATURE
    logits_bb = (kn @ kn.T - eye * BIG_NEG) / TEMPERATURE
    logits_ab = qn @ kn.T / TEMPERATURE
    logits_ba = logits_ab.T / TEMPERATURE
    labels = jnp.arange(B)

    def ce(logits):
        lse = jax.scipy.special.logsumexp(logits, axis=1)
        tgt = logits[jnp.arange(B), labels]
        return jnp.mean(lse - tgt)

    loss_a = ce(jnp.concatenate([logits_ab, logits_aa], axis=1))
    loss_b = ce(jnp.concatenate([logits_ba, logits_bb], axis=1))
    return (loss_a + loss_b) / 2.0


if __name__ == "__main__":
    key = jax.random.PRNGKey(0)
    kq, kk = jax.random.split(key)
    num_pairs, batch, ndim = 16, 8, 32

    q_pairs = jax.random.normal(kq, (num_pairs, batch, ndim), dtype=jnp.float32)
    k_pairs = jax.random.normal(kk, (num_pairs, batch, ndim), dtype=jnp.float32)

    # Batched path: 16 (q, k) pairs in ONE pallas_call (8 pairs/step, 2-step
    # "parallel" grid).
    losses = jax.block_until_ready(ntxent_loss_batched(q_pairs, k_pairs))
    refs = jnp.stack([_ntxent_ref(q_pairs[i], k_pairs[i]) for i in range(num_pairs)])
    assert jnp.allclose(losses, refs, rtol=1e-5, atol=1e-5), (losses, refs)

    # Single-pair path (module-equivalent signature).
    loss0 = jax.block_until_ready(ntxent_loss(q_pairs[0], k_pairs[0]))
    assert jnp.allclose(loss0, refs[0], rtol=1e-5, atol=1e-5), (loss0, refs[0])

    print("KERNEL_OK")
</pallas_src>

<mosaic_0001>
module attributes {stable_mosaic.version = 11 : i64} {
  func.func @_ntxent_kernel(%arg0: i32, %arg1: memref<8x8x32xf32, #tpu.memory_space<vmem>>, %arg2: memref<8x8x32xf32, #tpu.memory_space<vmem>>, %arg3: memref<16x16xf32, #tpu.memory_space<vmem>>, %arg4: memref<16x16xf32, #tpu.memory_space<vmem>>, %arg5: memref<8x1x128xf32, #tpu.memory_space<vmem>>, %arg6: memref<8x16x32xf32, #tpu.memory_space<vmem>>) attributes {dimension_semantics = [#tpu.dimension_semantics<parallel>], iteration_bounds = array<i64: 2>, scalar_prefetch = 0 : i64, scratch_operands = 1 : i64, tpu.core_type = #tpu.core_type<tc>, window_params = [{transform_indices = @transform_0, window_bounds = array<i64: 8, 8, 32>}, {transform_indices = @transform_1, window_bounds = array<i64: 8, 8, 32>}, {pipeline_mode = #tpu.pipeline_mode<synchronous>, transform_indices = @transform_2, window_bounds = array<i64: 16, 16>}, {pipeline_mode = #tpu.pipeline_mode<synchronous>, transform_indices = @transform_3, window_bounds = array<i64: 16, 16>}, {transform_indices = @transform_4, window_bounds = array<i64: 8, 1, 128>}]} {
    %c0 = arith.constant 0 : index
    %c0_0 = arith.constant 0 : index
    %c0_1 = arith.constant 0 : index
    %0 = vector.load %arg1[%c0, %c0_0, %c0_1] : memref<8x8x32xf32, #tpu.memory_space<vmem>>, vector<8x8x32xf32>
    %c0_2 = arith.constant 0 : index
    %c0_3 = arith.constant 0 : index
    %c0_4 = arith.constant 0 : index
    %1 = vector.load %arg2[%c0_2, %c0_3, %c0_4] : memref<8x8x32xf32, #tpu.memory_space<vmem>>, vector<8x8x32xf32>
    %2 = arith.mulf %0, %0 : vector<8x8x32xf32>
    %cst = arith.constant dense<0.000000e+00> : vector<8x8xf32>
    %3 = vector.multi_reduction <add>, %2, %cst [2] : vector<8x8x32xf32> to vector<8x8xf32>
    %4 = vector.shape_cast %3 : vector<8x8xf32> to vector<8x8x1xf32>
    %cst_5 = arith.constant 1.000000e-24 : f32
    %5 = vector.broadcast %cst_5 : f32 to vector<8x8x1xf32>
    %6 = arith.maximumf %4, %5 : vector<8x8x1xf32>
    %7 = math.rsqrt %6 : vector<8x8x1xf32>
    %8 = arith.mulf %1, %1 : vector<8x8x32xf32>
    %cst_6 = arith.constant dense<0.000000e+00> : vector<8x8xf32>
    %9 = vector.multi_reduction <add>, %8, %cst_6 [2] : vector<8x8x32xf32> to vector<8x8xf32>
    %10 = vector.shape_cast %9 : vector<8x8xf32> to vector<8x8x1xf32>
    %cst_7 = arith.constant 1.000000e-24 : f32
    %11 = vector.broadcast %cst_7 : f32 to vector<8x8x1xf32>
    %12 = arith.maximumf %10, %11 : vector<8x8x1xf32>
    %13 = math.rsqrt %12 : vector<8x8x1xf32>
    %14 = vector.broadcast %7 : vector<8x8x1xf32> to vector<8x8x32xf32>
    %15 = arith.mulf %0, %14 : vector<8x8x32xf32>
    %16 = vector.broadcast %13 : vector<8x8x1xf32> to vector<8x8x32xf32>
    %17 = arith.mulf %1, %16 : vector<8x8x32xf32>
    %18 = arith.mulf %15, %17 : vector<8x8x32xf32>
    %cst_8 = arith.constant dense<0.000000e+00> : vector<8x8xf32>
    %19 = vector.multi_reduction <add>, %18, %cst_8 [2] : vector<8x8x32xf32> to vector<8x8xf32>
    %20 = vector.shape_cast %19 : vector<8x8xf32> to vector<8x8x1xf32>
    %cst_9 = arith.constant dense<0.000000e+00> : vector<8x1xf32>
    %21 = vector.multi_reduction <add>, %20, %cst_9 [1] : vector<8x8x1xf32> to vector<8x1xf32>
    %22 = vector.shape_cast %21 : vector<8x1xf32> to vector<8x1x1xf32>
    %c0_10 = arith.constant 0 : index
    %c0_11 = arith.constant 0 : index
    %c0_12 = arith.constant 0 : index
    %23 = vector.load %arg6[%c0_10, %c0_11, %c0_12] : memref<8x16x32xf32, #tpu.memory_space<vmem>>, vector<8x8x32xf32>
    tpu.vector_store %arg6[%c0_10, %c0_11, %c0_12], %15 {strides = array<i32>} : memref<8x16x32xf32, #tpu.memory_space<vmem>>, vector<8x8x32xf32>,
    %c0_13 = arith.constant 0 : index
    %c8 = arith.constant 8 : index
    %c0_14 = arith.constant 0 : index
    %24 = vector.load %arg6[%c0_13, %c8, %c0_14] : memref<8x16x32xf32, #tpu.memory_space<vmem>>, vector<8x8x32xf32>
    tpu.vector_store %arg6[%c0_13, %c8, %c0_14], %17 {strides = array<i32>} : memref<8x16x32xf32, #tpu.memory_space<vmem>>, vector<8x8x32xf32>,
    %c0_15 = arith.constant 0 : index
    %c0_16 = arith.constant 0 : index
    %c0_17 = arith.constant 0 : index
    %25 = vector.load %arg6[%c0_15, %c0_16, %c0_17] : memref<8x16x32xf32, #tpu.memory_space<vmem>>, vector<8x16x32xf32>
    "tpu.trace_start"() <{level = 10 : i32, message = "pid,pjd->pij"}> : () -> ()
    %cst_18 = arith.constant dense<0.000000e+00> : vector<8x16x16xf32>
    %26 = tpu.matmul %25, %25, %cst_18 {dimension_numbers = #tpu.dot_dimension_numbers<[2], [2], [1], [1], [0, 0, 0, 1, 1, 1], [0], [0]>} : vector<8x16x32xf32>, vector<8x16x32xf32>, vector<8x16x16xf32> -> vector<8x16x16xf32>
    "tpu.trace_stop"() : () -> ()
    %c0_19 = arith.constant 0 : index
    %c0_20 = arith.constant 0 : index
    %27 = vector.load %arg3[%c0_19, %c0_20] : memref<16x16xf32, #tpu.memory_space<vmem>>, vector<16x16xf32>
    %28 = vector.shape_cast %27 : vector<16x16xf32> to vector<1x16x16xf32>
    %29 = vector.broadcast %28 : vector<1x16x16xf32> to vector<8x16x16xf32>
    %30 = arith.mulf %26, %29 : vector<8x16x16xf32>
    %c0_21 = arith.constant 0 : index
    %c0_22 = arith.constant 0 : index
    %31 = vector.load %arg4[%c0_21, %c0_22] : memref<16x16xf32, #tpu.memory_space<vmem>>, vector<16x16xf32>
    %32 = vector.shape_cast %31 : vector<16x16xf32> to vector<1x16x16xf32>
    %33 = vector.broadcast %32 : vector<1x16x16xf32> to vector<8x16x16xf32>
    %34 = arith.addf %30, %33 : vector<8x16x16xf32>
    %cst_23 = arith.constant dense<0xFF800000> : vector<8x16xf32>
    %35 = vector.multi_reduction <maximumf>, %34, %cst_23 [2] : vector<8x16x16xf32> to vector<8x16xf32>
    %36 = vector.shape_cast %35 : vector<8x16xf32> to vector<8x16x1xf32>
    %37 = vector.broadcast %36 : vector<8x16x1xf32> to vector<8x16x16xf32>
    %38 = arith.subf %34, %37 : vector<8x16x16xf32>
    %39 = math.exp %38 : vector<8x16x16xf32>
    %cst_24 = arith.constant dense<0.000000e+00> : vector<8x16xf32>
    %40 = vector.multi_reduction <add>, %39, %cst_24 [2] : vector<8x16x16xf32> to vector<8x16xf32>
    %41 = vector.shape_cast %40 : vector<8x16xf32> to vector<8x16x1xf32>
    %42 = math.log %41 : vector<8x16x1xf32>
    %43 = arith.addf %36, %42 : vector<8x16x1xf32>
    %cst_25 = arith.constant dense<0.000000e+00> : vector<8x1xf32>
    %44 = vector.multi_reduction <add>, %43, %cst_25 [1] : vector<8x16x1xf32> to vector<8x1xf32>
    %45 = vector.shape_cast %44 : vector<8x1xf32> to vector<8x1x1xf32>
    %cst_26 = arith.constant 1.000000e+01 : f32
    %cst_27 = arith.constant 1.000000e+02 : f32
    %46 = arith.addf %cst_26, %cst_27 : f32
    %47 = vector.broadcast %46 : f32 to vector<8x1x1xf32>
    %48 = arith.mulf %22, %47 : vector<8x1x1xf32>
    %49 = arith.subf %45, %48 : vector<8x1x1xf32>
    %cst_28 = arith.constant 1.600000e+01 : f32
    %50 = vector.broadcast %cst_28 : f32 to vector<8x1x1xf32>
    %51 = arith.divf %49, %50 : vector<8x1x1xf32>
    %52 = vector.shape_cast %51 : vector<8x1x1xf32> to vector<8x1x1xf32>
    %53 = vector.broadcast %52 : vector<8x1x1xf32> to vector<8x1x128xf32>
    %c0_29 = arith.constant 0 : index
    %c0_30 = arith.constant 0 : index
    %c0_31 = arith.constant 0 : index
    %54 = vector.load %arg5[%c0_29, %c0_30, %c0_31] : memref<8x1x128xf32, #tpu.memory_space<vmem>>, vector<8x1x128xf32>
    tpu.vector_store %arg5[%c0_29, %c0_30, %c0_31], %53 {strides = array<i32>} : memref<8x1x128xf32, #tpu.memory_space<vmem>>, vector<8x1x128xf32>,
    return
  }
  func.func @transform_0(%arg0: i32) -> (i32, i32, i32) {
    %c0_i32 = arith.constant 0 : i32
    %c0_i32_0 = arith.constant 0 : i32
    %c0_i32_1 = arith.constant 0 : i32
    return %arg0, %c0_i32, %c0_i32_0 : i32, i32, i32
  }
  func.func @transform_1(%arg0: i32) -> (i32, i32, i32) {
    %c0_i32 = arith.constant 0 : i32
    %c0_i32_0 = arith.constant 0 : i32
    %c0_i32_1 = arith.constant 0 : i32
    return %arg0, %c0_i32, %c0_i32_0 : i32, i32, i32
  }
  func.func @transform_2(%arg0: i32) -> (i32, i32) {
    %c0_i32 = arith.constant 0 : i32
    %c0_i32_0 = arith.constant 0 : i32
    %c0_i32_1 = arith.constant 0 : i32
    return %c0_i32, %c0_i32_0 : i32, i32
  }
  func.func @transform_3(%arg0: i32) -> (i32, i32) {
    %c0_i32 = arith.constant 0 : i32
    %c0_i32_0 = arith.constant 0 : i32
    %c0_i32_1 = arith.constant 0 : i32
    return %c0_i32, %c0_i32_0 : i32, i32
  }
  func.func @transform_4(%arg0: i32) -> (i32, i32, i32) {
    %c0_i32 = arith.constant 0 : i32
    %c0_i32_0 = arith.constant 0 : i32
    %c0_i32_1 = arith.constant 0 : i32
    return %arg0, %c0_i32, %c0_i32_0 : i32, i32, i32
  }
}

</mosaic_0001>

<bundles_post_ra>
// kernel: tpu_custom_call.1
= control target key start
LH: loop header
LB: loop body
LE: loop exit
PB: predicated region body
PF: predicated region fallthrough
CT: control target
= control target key end

     0   :  { %s2614_s0 = inlined_call_operand.hbm [shape: f32[16,8,32], index: 0, kind: input, shape index: {}]   ;;  %s2615_s1 = inlined_call_operand.hbm [shape: f32[16,8,32], index: 1, kind: input, shape index: {}]   ;;  %s2616_s2 = inlined_call_operand.hbm [shape: f32[16,16], index: 2, kind: input, shape index: {}]   ;;  %s2617_s3 = inlined_call_operand.hbm [shape: f32[16,16], index: 3, kind: input, shape index: {}]   ;;  %s2618_s4 = inlined_call_operand.hbm [shape: f32[16,1,128], index: 4, kind: output, shape index: {}]  }
   0x1   :  { %2623 = sst [smem:[#allocation17_spill]] %s2614_s0 }
   0x2   :  { %2624 = sst [smem:[#allocation18_spill]] %s2616_s2 }
   0x3   :  { %2625 = sst [smem:[#allocation19_spill]] %s2617_s3 }
   0x4   :  { %9 = vsyncpa [#allocation4], 0 }
   0x5   :  { %11 = vsyncpa [#allocation4 + $0x1], 0 }
   0x6   :  { %12 = vsyncpa [#allocation7], 0 }
   0x7   :  { %14 = vsyncpa [#allocation7 + $0x1], 0 }
   0x8   :  { %15 = vsyncpa [#allocation10], 0 }
   0x9   :  { %16 = vsyncpa [#allocation5], 0 }
   0xa   :  { %18 = vsyncpa [#allocation5 + $0x1], 0  ;;  %s1829_s15 = smov 0   ;;  %s1831_s16 = smov 0  }
   0xb   :  { %s1833_s17 = smov 0   ;;  %s1835_s18 = smov 0  }
   0xc LB: > { %s1850_s19 = sadd.s32 4294967295, %s1795_s18   ;;  %s1367_s20 = sadd.s32 4294967294, %s1795_s18   ;;  %s1795_s18 = sphi %s1835_s18, %s2640_s18   ;;  %s1791_s17 = sphi %s1833_s17, %s2639_s17   ;;  %s1787_s16 = sphi %s1831_s16, %s2638_s16   ;;  %s1783_s15 = sphi %s1829_s15, %s2637_s15  }
   0xd   : > { %p44_p0 = scmp.ne.s32.totalorder %s1787_s16, %s1783_s15  ;;  %p45_p1 = scmp.eq.s32.totalorder %s1850_s19, 0 }
   0xe   : > { %p136_p2 = scmp.eq.s32.totalorder %s1850_s19, 1  ;;  %p142_p3 = scmp.eq.s32.totalorder %s1367_s20, 1 }
   0xf   : > { %p1859_p4 = por %p45_p1, %p44_p0  ;;  %p1368_p5 = scmp.ge.s32.totalorder %s1795_s18, 1 }
  0x10   : > { %p1864_p6 = por %p142_p3, %p44_p0  ;;  %p149_p7 = scmp.lt.s32.totalorder %s1795_s18, 3 }
  0x11   : > { %s2628_s2 = sld [smem:[#allocation18_spill]]  ;;  %s1797_s27 = smov [#allocation8]  }
  0x12   : > { %p1872_p8 = pnand %p1368_p5, %p149_p7  ;;  %s162_s28 = sshll.u32 %s1797_s27, 4  ;;  %s163_s28 = int_to_ptr.vmem [resolvable:$true] %s162_s28 }
  0x13   : > { %s2630_s3 = sld [smem:[#allocation19_spill]]  ;;  %s2619_s6 = smov 128  }
  0x14   : > { %p1436_p9 = pneg %p1872_p8  ;;  %s2621_s7 = smov 8  }
  0x15   : > { %s1800_s8 = smov [#allocation9]   ;;  %s1891_s10 = sadd.s32 1, %s1795_s18  }
  0x16   : > { %p1437_p10 = pnand %p1436_p9, %p45_p1  ;;  %s176_s9 = sshll.u32 %s1800_s8, 4  ;;  %s177_s9 = int_to_ptr.vmem [resolvable:$true] %s176_s9 }
  0x17   : > { %s160_s25 = sshll.u32 %s2628_s2, 4  ;;  %s31_s11 = sadd.s32 1, %s1791_s17  ;;  %s161_s25 = int_to_ptr.hbm [resolvable:$true] %s160_s25 }
  0x18   : > { %1439 = dma.hbm_to_vmem [thread:$0]  (!%p1437_p10), %s161_s25, 256, %s163_s28, [#allocation7], %s2619_s6, %s2619_s6, %s2621_s7  }
  0x19   : > { %s174_s5 = sshll.u32 %s2630_s3, 4  ;;  %s28_s12 = ssub.s32 %s1795_s18, %s1891_s10  ;;  %s175_s5 = int_to_ptr.hbm [resolvable:$true] %s174_s5 }
  0x1a   : > { %1442 = dma.hbm_to_vmem [thread:$0]  (!%p1437_p10), %s175_s5, 256, %s177_s9, [#allocation10], %s2619_s6, %s2619_s6, %s2621_s7  }
  0x1b   : > { %p38_p12 = scmp.ne.s32.totalorder %s1791_s17, %s1787_s16  ;;  %p29_p13 = scmp.eq.s32.totalorder %s28_s12, 0 }
  0x1c   : > { %p39_p0 = scmp.eq.s32.totalorder %s1795_s18, 0  ;;  %p1456_p5 = scmp.lt.s32.totalorder %s1795_s18, 2 }
  0x1d   : > { %p1901_p3 = por %p136_p2, %p38_p12  ;;  %s190_s20 = sand.u32 1, %s1791_s17  }
  0x1e   : > { %s1907_s14 = scalar_select %p29_p13, %s1791_s17, %s31_s11  }
  0x1f   : > { %p40_p7 = por %p39_p0, %p38_p12  ;;  %s1910_s23 = sshll.u32 %s190_s20, 6 }
  0x20   : > { %s1420_s24 = sshll.u32 %s1795_s18, 6  ;;  %s2632_s0 = sld [smem:[#allocation17_spill]] }
  0x21   : > { %s194_s29 = scalar_lea.vmem [#allocation3], %s1910_s23  ;;  %p1917_p2 = pnand %p1456_p5, %p40_p7 }
  0x22   : > { %s202_s30 = sshll.u32 %s194_s29, 4  ;;  %s221_s12 = scalar_lea.hbm %s2615_s1, %s1420_s24  ;;  %s203_s30 = int_to_ptr.vmem [resolvable:$true] %s202_s30 }
  0x23   : > { %s222_s6 = sshll.u32 %s221_s12, 4  ;;  %s191_s7 = scalar_lea.sflag [#allocation4], %s190_s20  ;;  %s223_s6 = int_to_ptr.hbm [resolvable:$true] %s222_s6 }
  0x24   : > { %p1661_p10 = pneg %p1917_p2 }
  0x26   : > { %s199_s28 = scalar_lea.hbm %s2632_s0, %s1420_s24  ;;  %s1664_s29 = scalar_lea.hbm %s2632_s0, 128 }
  0x27   : > { %s200_s5 = sshll.u32 %s199_s28, 4  ;;  %s201_s5 = int_to_ptr.hbm [resolvable:$true] %s200_s5 }
  0x28   : > { %s1657_s2 = sshra.s32 %s201_s5, 4  ;;  %s1658_s2 = int_to_ptr.hbm [resolvable:$true] %s1657_s2 }
  0x29   : > { %s1659_s25 = scalar_lea.hbm %s1658_s2, 64  ;;  %p1665_p0 = scmp.lt.s32.totalorder %s1658_s2, %s2632_s0 }
  0x2a   : > { %p1660_p9 = scmp.ne.s32.totalorder %s1658_s2, %s1659_s25  ;;  %p1666_p5 = scmp.lt.s32.totalorder %s1664_s29, %s1659_s25 }
  0x2c   : > { %p1662_p12 = pnand %p1661_p10, %p1660_p9  ;;  %p1667_p7 = por %p1666_p5, %p1665_p0 }
  0x2e   : > { %p1663_p13 = pneg %p1662_p12 }
  0x30   : > { %p1668_p11 = pnand %p1667_p7, %p1663_p13 }
  0x32   : > { %1671 = shalt.err (!%p1668_p11)
}
  0x33   : > { %s2634_s20 = smov 8   ;;  %s2635_s24 = smov 128  }
  0x34   : > { %1446 = dma.hbm_to_vmem [thread:$0]  (!%p1917_p2), %s201_s5, 1024, %s203_s30, %s191_s7, %s2635_s24, %s2635_s24, %s2634_s20  }
  0x35   : > { %s216_s12 = scalar_lea.vmem [#allocation6], %s1910_s23  ;;  %s212_s28 = sand.u32 1, %s1795_s18  }
  0x36   : > { %s224_s27 = sshll.u32 %s216_s12, 4  ;;  %s213_s9 = scalar_lea.sflag [#allocation7], %s212_s28  ;;  %s225_s27 = int_to_ptr.vmem [resolvable:$true] %s224_s27 }
  0x37   : > { %s1687_s2 = sshra.s32 %s223_s6, 4  ;;  %s1694_s0 = scalar_lea.hbm %s2615_s1, 128  ;;  %s1688_s2 = int_to_ptr.hbm [resolvable:$true] %s1687_s2 }
  0x38   : > { %s1689_s25 = scalar_lea.hbm %s1688_s2, 64  ;;  %p1695_p13 = scmp.lt.s32.totalorder %s1688_s2, %s2615_s1 }
  0x39   : > { %p1690_p9 = scmp.ne.s32.totalorder %s1688_s2, %s1689_s25  ;;  %p1696_p0 = scmp.lt.s32.totalorder %s1694_s0, %s1689_s25 }
  0x3b   : > { %p1692_p11 = pnand %p1690_p9, %p1661_p10  ;;  %p1697_p5 = por %p1696_p0, %p1695_p13 }
  0x3d   : > { %p1693_p12 = pneg %p1692_p11 }
  0x3f   : > { %p1698_p7 = pnand %p1697_p5, %p1693_p12 }
  0x41   : > { %1701 = shalt.err (!%p1698_p7)
}
  0x42   : > { %1449 = dma.hbm_to_vmem [thread:$0]  (!%p1917_p2), %s223_s6, 1024, %s225_s27, %s213_s9, %s2635_s24, %s2635_s24, %s2634_s20  }
  0x43   : > { %236 = sbr.rel (%p1872_p8) target bundleno = 705 (0x2c1), region = 36  ;;  %s1959_s23 = sand.u32 (!%p1872_p8), 1, %s1787_s16  }
  0x44   : > { %s1379_s3 = sshll.u32 (!%p1872_p8), %s1959_s23, 6  ;;  %s239_s0 = scalar_lea.sflag (!%p1872_p8), [#allocation4], %s1959_s23 }
  0x45   : > { %s1963_s30 = scalar_lea.vmem (!%p1872_p8), [#allocation3], %s1379_s3 }
  0x48   : > { %1762 = dma.done.wait (%p1859_p4), %s239_s0, 1024  }
  0x49   : > { %1764 = vsyncadd (%p1859_p4), %s239_s0, 4294966272  ;;  %s248_s6 = sand.u32 1, %s1850_s19   ;;  %s1970_s5 = scalar_lea.vmem [#allocation6], %s1379_s3 }
  0x4a   : > { %s249_s26 = scalar_lea.sflag [#allocation7], %s248_s6 }
  0x4b   : > { %1766 = dma.done.wait (%p1859_p4), %s249_s26, 1024  }
  0x4c   : > { %1768 = vsyncadd (%p1859_p4), %s249_s26, 4294966272 }
  0x4d   : > { %1770 = dma.done.wait (%p45_p1), [#allocation7], 256  }
  0x4e   : > { %1772 = vsyncadd (%p45_p1), [#allocation7], 4294967040 }
  0x4f   : > { %1774 = dma.done.wait (%p45_p1), [#allocation10], 256  }
  0x50   : > { %1776 = vsyncadd (%p45_p1), [#allocation10], 4294967040  ;;  %v1985_v0 = vld [vmem:[%s1970_s5 + $0x10] sm:$0xff]  ;;  %vm320_vm0 = vcmask 261120   ;;  %v1988_v1 = vld [vmem:[%s1970_s5] sm:$0xff]  ;;  %s1383_s21 = sshll.u32 %s1959_s23, 3 }
  0x51   : > { %v1991_v2 = vld [vmem:[%s1963_s30 + $0x10] sm:$0xff]  ;;  %v435_v3 = vmul.f32 %v1985_v0, %v1985_v0  ;;  %v433_v4 = vmul.f32 %v1988_v1, %v1988_v1  ;;  %v2000_v6 = vld [vmem:[%s1970_s5 + $0x18] sm:$0xff]  ;;  %v2003_v7 = vld [vmem:[%s1970_s5 + $0x8] sm:$0xff]  ;;  %s2555_s8 = scalar_lea.vmem [#allocation11], %s1383_s21  ;;  %s1417_s20 = sshll.u32 %s1850_s19, 3 }
  0x52   : > { %v314_v5 = vmul.f32 %v1991_v2, %v1991_v2  ;;  %v2009_v11 = vld [vmem:[%s1963_s30 + $0x18] sm:$0xff]  ;;  %v436_v12 = vmul.f32 %v2000_v6, %v2000_v6  ;;  %v434_v13 = vmul.f32 %v2003_v7, %v2003_v7  ;;  %v2021_v18 = vld [vmem:[%s1970_s5 + $0x30] sm:$0xff]  ;;  %v2024_v19 = vld [vmem:[%s1963_s30] sm:$0xff]  ;;  %s1248_s27 = scalar_lea.hbm %s2618_s4, %s1417_s20  ;;  %s1249_s19 = sshll.u32 %s2555_s8, 4  ;;  %s1250_s19 = int_to_ptr.vmem [resolvable:$true] %s1249_s19 }
  0x53   : > { %v447_v8 = vsel %vm320_vm0, %v435_v3, 0.0  ;;  %v441_v9 = vsel %vm320_vm0, %v433_v4, 0.0  ;;  %v315_v14 = vmul.f32 %v2009_v11, %v2009_v11  ;;  %v2027_v20 = vld [vmem:[%s1963_s30 + $0x8] sm:$0xff]  ;;  %v439_v21 = vmul.f32 %v2021_v18, %v2021_v18  ;;  %v2039_v27 = vld [vmem:[%s1963_s30 + $0x38] sm:$0xff]  ;;  %v2045_v29 = vld [vmem:[%s1963_s30 + $0x30] sm:$0xff]  ;;  %s1251_s28 = sshll.u32 %s1248_s27, 4  ;;  %s1252_s28 = int_to_ptr.hbm [resolvable:$true] %s1251_s28 }
  0x54   : > { %v327_v10 = vsel %vm320_vm0, %v314_v5, 0.0  ;;  %448 = vadd.xlane.f32.xlu0 %v447_v8  ;;  %442 = vadd.xlane.f32.xlu2 %v441_v9  ;;  %v450_v15 = vsel %vm320_vm0, %v436_v12, 0.0  ;;  %v444_v16 = vsel %vm320_vm0, %v434_v13, 0.0  ;;  %v312_v22 = vmul.f32 %v2024_v19, %v2024_v19  ;;  %v2042_v28 = vld [vmem:[%s1970_s5 + $0x38] sm:$0xff]  ;;  %v2057_v36 = vld [vmem:[%s1963_s30 + $0x20] sm:$0xff]  ;;  %v2063_v38 = vld [vmem:[%s1970_s5 + $0x28] sm:$0xff] }
  0x55   : > { %328 = vadd.xlane.f32.xlu1 %v327_v10  ;;  %v330_v17 = vsel %vm320_vm0, %v315_v14, 0.0  ;;  %v313_v23 = vmul.f32 %v2027_v20, %v2027_v20  ;;  %v459_v24 = vsel %vm320_vm0, %v439_v21, 0.0  ;;  %v319_v30 = vmul.f32 %v2039_v27, %v2039_v27  ;;  %v2060_v37 = vld [vmem:[%s1970_s5 + $0x20] sm:$0xff]  ;;  %v2075_v45 = vld [vmem:[%s1963_s30 + $0x28] sm:$0xff]  ;;  %s1238_s9 = scalar_lea.sflag [#allocation5], %s1959_s23  ;;  %s1731_s2 = sshra.s32 %s1252_s28, 4  ;;  %s1732_s2 = int_to_ptr.hbm [resolvable:$true] %s1731_s2 }
  0x56   : > { %v321_v25 = vsel %vm320_vm0, %v312_v22, 0.0  ;;  %v440_v31 = vmul.f32 %v2042_v28, %v2042_v28  ;;  %v318_v32 = vmul.f32 %v2045_v29, %v2045_v29  ;;  %v316_v39 = vmul.f32 %v2057_v36, %v2057_v36  ;;  %s1733_s25 = scalar_lea.hbm %s1732_s2, 8  ;;  %s1737_s7 = scalar_lea.hbm %s2618_s4, 16 }
  0x57   : > { %v324_v26 = vsel %vm320_vm0, %v313_v23, 0.0  ;;  %v342_v33 = vsel %vm320_vm0, %v319_v30, 0.0  ;;  %v437_v40 = vmul.f32 %v2060_v37, %v2060_v37  ;;  %v438_v41 = vmul.f32 %v2063_v38, %v2063_v38  ;;  %p1734_p1 = scmp.ne.s32.totalorder %s1732_s2, %s1733_s25  ;;  %p1738_p2 = scmp.lt.s32.totalorder %s1732_s2, %s2618_s4 }
  0x58   : > { %v462_v34 = vsel %vm320_vm0, %v440_v31, 0.0  ;;  %v339_v35 = vsel %vm320_vm0, %v318_v32, 0.0  ;;  %v333_v42 = vsel %vm320_vm0, %v316_v39, 0.0  ;;  %v317_v46 = vmul.f32 %v2075_v45, %v2075_v45  ;;  %p1739_p10 = scmp.lt.s32.totalorder %s1737_s7, %s1733_s25 }
  0x59   : > { %v453_v43 = vsel %vm320_vm0, %v437_v40, 0.0  ;;  %v456_v44 = vsel %vm320_vm0, %v438_v41, 0.0  ;;  %p1735_p4 = pnand %p1734_p1, %p1901_p3 }
  0x5a   : > { %v336_v47 = vsel %vm320_vm0, %v317_v46, 0.0  ;;  %p1740_p9 = por %p1739_p10, %p1738_p2 }
  0x5b   : > { %p1736_p8 = pneg %p1735_p4 }
  0x5c   : > { %451 = vadd.xlane.f32.xlu0 %v450_v15  ;;  %445 = vadd.xlane.f32.xlu2 %v444_v16 }
  0x5d   : > { %331 = vadd.xlane.f32.xlu1 %v330_v17  ;;  %p1741_p11 = pnand %p1740_p9, %p1736_p8 }
  0x64   : > { %460 = vadd.xlane.f32.xlu2 %v459_v24  ;;  %322 = vadd.xlane.f32.xlu0 %v321_v25 }
  0x65   : > { %325 = vadd.xlane.f32.xlu1 %v324_v26 }
  0x6c   : > { %343 = vadd.xlane.f32.xlu2 %v342_v33  ;;  %463 = vadd.xlane.f32.xlu0 %v462_v34 }
  0x6d   : > { %340 = vadd.xlane.f32.xlu1 %v339_v35 }
  0x74   : > { %334 = vadd.xlane.f32.xlu2 %v333_v42  ;;  %454 = vadd.xlane.f32.xlu0 %v453_v43 }
  0x75   : > { %457 = vadd.xlane.f32.xlu1 %v456_v44 }
  0x7c   : > { %337 = vadd.xlane.f32.xlu0 %v336_v47 }
  0xc7   : > { %v449_v48 = vpop.xlane.xlu0 %448  ;;  %v443_v49 = vpop.xlane.xlu2 %442 }
  0xc8   : > { %v467_v50 = vmax.f32 %v449_v48, 1e-24  ;;  %v465_v51 = vmax.f32 %v443_v49, 1e-24  ;;  %v329_v52 = vpop.xlane.xlu1 %328 }
  0xc9   : > { %v347_v53 = vmax.f32 %v329_v52, 1e-24 }
  0xca   : > { %1499 = vrsqrt.f32 %v467_v50  ;;  %vm499_vm1 = vweird.f32 %v467_v50  ;;  %vm479_vm3 = vweird.f32 %v465_v51 }
  0xcb   : > { %1501 = vrsqrt.f32 %v465_v51  ;;  %vm379_vm5 = vweird.f32 %v347_v53 }
  0xcc   : > { %1503 = vrsqrt.f32 %v347_v53 }
  0xcf   : > { %v452_v54 = vpop.xlane.xlu0 %451  ;;  %v446_v55 = vpop.xlane.xlu2 %445 }
  0xd0   : > { %v1500_v56 = vpop.eup %1499  ;;  %v2080_v57 = vmax.f32 %v452_v54, 1e-24  ;;  %v2082_v58 = vmax.f32 %v446_v55, 1e-24  ;;  %v332_v59 = vpop.xlane.xlu1 %331 }
  0xd1   : > { %v1502_v60 = vpop.eup %1501  ;;  %v494_v61 = vmul.f32 %v1500_v56, %v467_v50  ;;  %v2084_v62 = vmax.f32 %v332_v59, 1e-24  ;;  %vm500_vm2 = vweird.f32 %v1500_v56 }
  0xd2   : > { %v1504_v63 = vpop.eup %1503  ;;  %v474_v3 = vmul.f32 %v1502_v60, %v465_v51  ;;  %1505 = vrsqrt.f32 %v2080_v57  ;;  %vm480_vm4 = vweird.f32 %v1502_v60  ;;  %vm509_vm7 = vweird.f32 %v2080_v57  ;;  %vm501_vm8 = vmor %vm499_vm1, %vm500_vm2 }
  0xd3   : > { %v495_v4 = vmul.f32 %v1500_v56, %v494_v61  ;;  %v374_v5 = vmul.f32 %v1504_v63, %v347_v53  ;;  %1507 = vrsqrt.f32 %v2082_v58  ;;  %vm380_vm6 = vweird.f32 %v1504_v63  ;;  %vm481_vm9 = vmor %vm479_vm3, %vm480_vm4 }
  0xd4   : > { %v475_v8 = vmul.f32 %v1502_v60, %v474_v3  ;;  %1509 = vrsqrt.f32 %v2084_v62  ;;  %vm381_vm10 = vmor %vm379_vm5, %vm380_vm6  ;;  %vm489_vm11 = vweird.f32 %v2082_v58  ;;  %vm389_vm12 = vweird.f32 %v2084_v62 }
  0xd5   : > { %v496_v9 = vmul.f32 0.5, %v495_v4  ;;  %v375_v10 = vmul.f32 %v1504_v63, %v374_v5 }
  0xd6   : > { %v476_v12 = vmul.f32 0.5, %v475_v8 }
  0xd7   : > { %v497_v13 = vsub.f32 1.5, %v496_v9  ;;  %v376_v14 = vmul.f32 0.5, %v375_v10  ;;  %v461_v15 = vpop.xlane.xlu2 %460  ;;  %v323_v16 = vpop.xlane.xlu0 %322 }
  0xd8   : > { %v2089_v17 = vpop.eup %1505  ;;  %v477_v21 = vsub.f32 1.5, %v476_v12  ;;  %v2091_v22 = vmax.f32 %v461_v15, 1e-24  ;;  %v326_v23 = vpop.xlane.xlu1 %325  ;;  %v2105_v34 = vmax.f32 %v323_v16, 1e-24 }
  0xd9   : > { %v2093_v24 = vpop.eup %1507  ;;  %v498_v25 = vmul.f32 %v1500_v56, %v497_v13  ;;  %v377_v26 = vsub.f32 1.5, %v376_v14  ;;  %v504_v30 = vmul.f32 %v2089_v17, %v2080_v57  ;;  %v2127_v51 = vmax.f32 %v326_v23, 1e-24 }
  0xda   : > { %v2098_v31 = vpop.eup %1509  ;;  %v478_v32 = vmul.f32 %v1502_v60, %v477_v21  ;;  %v484_v33 = vmul.f32 %v2093_v24, %v2082_v58  ;;  %1511 = vrsqrt.f32 %v2091_v22  ;;  %vm510_vm13 = vweird.f32 %v2089_v17 }
  0xdb   : > { %v502_v35 = vsel %vm501_vm8, %v1500_v56, %v498_v25  ;;  %v378_v39 = vmul.f32 %v1504_v63, %v377_v26  ;;  %v505_v40 = vmul.f32 %v2089_v17, %v504_v30  ;;  %v384_v41 = vmul.f32 %v2098_v31, %v2084_v62  ;;  %vm511_vm1 = vmor %vm509_vm7, %vm510_vm13 }
  0xdc   : > { %v2113_v42 = vmul.f32 %v502_v35, %v1985_v0  ;;  %v482_v43 = vsel %vm481_vm9, %v1502_v60, %v478_v32  ;;  %v485_v44 = vmul.f32 %v2093_v24, %v484_v33  ;;  %1513 = vrsqrt.f32 %v2105_v34 }
  0xdd   : > { %v2120_v46 = vmul.f32 %v482_v43, %v1988_v1  ;;  %v382_v47 = vsel %vm381_vm10, %v1504_v63, %v378_v39  ;;  %v506_v48 = vmul.f32 0.5, %v505_v40  ;;  %v385_v49 = vmul.f32 %v2098_v31, %v384_v41 }
  0xde   : > { %659 = vst.msk [vmem:[#allocation2 + $0x28] sm:$0xff] %vm320_vm0, %v2113_v42  ;;  %v555_v0 = vmul.f32 %v382_v47, %v1991_v2  ;;  %v486_v50 = vmul.f32 0.5, %v485_v44  ;;  %vm490_vm14 = vweird.f32 %v2093_v24  ;;  %1515 = vrsqrt.f32 %v2127_v51 }
  0xdf   : > { %657 = vst.msk [vmem:[#allocation2 + $0x8] sm:$0xff] %vm320_vm0, %v2120_v46  ;;  %v507_v52 = vsub.f32 1.5, %v506_v48  ;;  %v386_v1 = vmul.f32 0.5, %v385_v49  ;;  %v344_v53 = vpop.xlane.xlu2 %343  ;;  %v464_v54 = vpop.xlane.xlu0 %463  ;;  %vm390_vm15 = vweird.f32 %v2098_v31  ;;  %vm491_vm2 = vmor %vm489_vm11, %vm490_vm14  ;;  %vm539_vm4 = vweird.f32 %v2091_v22 }
  0xe0   : > { %v2133_v55 = vpop.eup %1511  ;;  %651 = vst.msk [vmem:[#allocation2 + $0x20] sm:$0xff] %vm320_vm0, %v555_v0  ;;  %v487_v2 = vsub.f32 1.5, %v486_v50  ;;  %v2138_v56 = vmax.f32 %v344_v53, 1e-24  ;;  %v341_v59 = vpop.xlane.xlu1 %340  ;;  %v2157_v10 = vmax.f32 %v464_v54, 1e-24  ;;  %vm391_vm3 = vmor %vm389_vm12, %vm390_vm15  ;;  %vm369_vm5 = vweird.f32 %v2127_v51 }
  0xe1   : > { %v508_v60 = vmul.f32 %v2089_v17, %v507_v52  ;;  %v387_v61 = vsub.f32 1.5, %v386_v1  ;;  %v534_v63 = vmul.f32 %v2133_v55, %v2091_v22  ;;  %v2150_v4 = vmax.f32 %v341_v59, 1e-24 }
  0xe2   : > { %v488_v3 = vmul.f32 %v2093_v24, %v487_v2  ;;  %1517 = vrsqrt.f32 %v2138_v56  ;;  %v2165_v13 = vpop.eup %1513  ;;  %vm359_vm6 = vweird.f32 %v2105_v34  ;;  %vm540_vm7 = vweird.f32 %v2133_v55 }
  0xe3   : > { %v512_v5 = vsel %vm511_vm1, %v2089_v17, %v508_v60  ;;  %v388_v8 = vmul.f32 %v2098_v31, %v387_v61  ;;  %v535_v9 = vmul.f32 %v2133_v55, %v534_v63  ;;  %1519 = vrsqrt.f32 %v2150_v4  ;;  %vm541_vm10 = vmor %vm539_vm4, %vm540_vm7 }
  0xe4   : > { %v564_v57 = vmul.f32 %v512_v5, %v2000_v6  ;;  %v492_v12 = vsel %vm491_vm2, %v2093_v24, %v488_v3  ;;  %1521 = vrsqrt.f32 %v2157_v10  ;;  %v2174_v16 = vpop.eup %1515  ;;  %v354_v17 = vmul.f32 %v2165_v13, %v2105_v34 }
  0xe5   : > { %v2168_v58 = vmul.f32 %v492_v12, %v2003_v7  ;;  %v392_v14 = vsel %vm391_vm3, %v2098_v31, %v388_v8  ;;  %v536_v15 = vmul.f32 0.5, %v535_v9  ;;  %v2172_v6 = vld [vmem:[#allocation2 + $0x28] sm:$0xff]  ;;  %v2194_v25 = vmul.f32 %v2113_v42, %v555_v0 }
  0xe6   : > { %660 = vst.msk [vmem:[#allocation2 + $0x38] sm:$0xff] %vm320_vm0, %v564_v57  ;;  %v556_v62 = vmul.f32 %v392_v14, %v2009_v11  ;;  %v2182_v7 = vld [vmem:[#allocation2 + $0x8] sm:$0xff]  ;;  %1392 = vmatpush.xpose.msk.msra.mxu2 %vm320_vm0, %v2172_v6  ;;  %v364_v11 = vmul.f32 %v2174_v16, %v2127_v51  ;;  %v355_v30 = vmul.f32 %v2165_v13, %v354_v17  ;;  %vm429_vm8 = vweird.f32 %v2138_v56 }
  0xe7   : > { %658 = vst.msk [vmem:[#allocation2 + $0x18] sm:$0xff] %vm320_vm0, %v2168_v58  ;;  %v537_v21 = vsub.f32 1.5, %v536_v15  ;;  %1384 = vmatpush.xpose.msk.msra.mxu0 %vm320_vm0, %v2182_v7  ;;  %v335_v23 = vpop.xlane.xlu2 %334  ;;  %v455_v24 = vpop.xlane.xlu0 %454  ;;  %vm419_vm9 = vweird.f32 %v2150_v4  ;;  %v669_v41 = vld [vmem:[#allocation2 + $0x20] sm:$0xff]  ;;  %vm360_vm11 = vweird.f32 %v2165_v13  ;;  %vm370_vm12 = vweird.f32 %v2174_v16 }
  0xe8   : > { %v2196_v26 = vpop.eup %1517  ;;  %652 = vst.msk [vmem:[#allocation2 + $0x30] sm:$0xff] %vm320_vm0, %v556_v62  ;;  %v2201_v31 = vmax.f32 %v335_v23, 1e-24  ;;  %v458_v32 = vpop.xlane.xlu1 %457  ;;  %v2203_v33 = vmul.f32 %v564_v57, %v556_v62  ;;  %v365_v39 = vmul.f32 %v2174_v16, %v364_v11  ;;  %v356_v43 = vmul.f32 0.5, %v355_v30  ;;  %vm361_vm14 = vmor %vm359_vm6, %vm360_vm11 }
  0xe9   : > { %v538_v35 = vmul.f32 %v2133_v55, %v537_v21  ;;  %v424_v40 = vmul.f32 %v2196_v26, %v2138_v56  ;;  %v2210_v42 = vpop.eup %1519  ;;  %v2217_v44 = vmax.f32 %v458_v32, 1e-24  ;;  %v2219_v47 = vmax.f32 %v455_v24, 1e-24  ;;  %vm371_vm15 = vmor %vm369_vm5, %vm370_vm12 }
  0xea   : > { %1523 = vrsqrt.f32 %v2201_v31  ;;  %1393 = vmatpush.xpose.msk.msra.mxu2 %vm320_vm0, %v669_v41  ;;  %v2222_v48 = vpop.eup %1521  ;;  %v366_v0 = vmul.f32 0.5, %v365_v39  ;;  %v414_v22 = vmul.f32 %v2210_v42, %v2150_v4  ;;  %v357_v1 = vsub.f32 1.5, %v356_v43 }
  0xeb   : > { %v542_v49 = vsel %vm541_vm10, %v2133_v55, %v538_v35  ;;  %v425_v50 = vmul.f32 %v2196_v26, %v424_v40  ;;  %v544_v53 = vmul.f32 %v2222_v48, %v2157_v10  ;;  %vm430_vm13 = vweird.f32 %v2196_v26 }
  0xec   : > { %v2229_v52 = vmul.f32 %v542_v49, %v2021_v18  ;;  %v367_v54 = vsub.f32 1.5, %v366_v0  ;;  %v415_v55 = vmul.f32 %v2210_v42, %v414_v22  ;;  %v358_v18 = vmul.f32 %v2165_v13, %v357_v1  ;;  %vm431_vm2 = vmor %vm429_vm8, %vm430_vm13 }
  0xed   : > { %v426_v2 = vmul.f32 0.5, %v425_v50  ;;  %1394 = vmatmul.msk.f32.vlgmr.msra.gmra.mxu2 %vm320_vm0, %v669_v41  ;;  %v2237_v59 = vld [vmem:[#allocation2 + $0x38] sm:$0xff]  ;;  %v545_v60 = vmul.f32 %v2222_v48, %v544_v53  ;;  %1525 = vrsqrt.f32 %v2217_v44  ;;  %vm420_vm1 = vweird.f32 %v2210_v42 }
  0xee   : > { %663 = vst.msk [vmem:[#allocation2 + $0x68] sm:$0xff] %vm320_vm0, %v2229_v52  ;;  %v2245_v61 = vld [vmem:[#allocation2 + $0x18] sm:$0xff]  ;;  %1396 = vmatpush.xpose.msk.msra.mxu3 %vm320_vm0, %v2237_v59  ;;  %v368_v63 = vmul.f32 %v2174_v16, %v367_v54  ;;  %v416_v5 = vmul.f32 0.5, %v415_v55  ;;  %1527 = vrsqrt.f32 %v2219_v47  ;;  %v362_v57 = vsel %vm361_vm14, %v2165_v13, %v358_v18  ;;  %vm421_vm5 = vmor %vm419_vm9, %vm420_vm1 }
  0xef   : > { %v427_v3 = vsub.f32 1.5, %v426_v2  ;;  %1388 = vmatpush.xpose.msk.msra.mxu1 %vm320_vm0, %v2245_v61  ;;  %v338_v8 = vpop.xlane.xlu0 %337  ;;  %v546_v34 = vmul.f32 0.5, %v545_v60  ;;  %v553_v15 = vmul.f32 %v362_v57, %v2024_v19  ;;  %v671_v21 = vld [vmem:[#allocation2 + $0x30] sm:$0xff]  ;;  %vm550_vm3 = vweird.f32 %v2222_v48 }
  0xf0   : > { %v2257_v9 = vpop.eup %1523  ;;  %v2265_v12 = vmax.f32 %v338_v8, 1e-24  ;;  %v372_v14 = vsel %vm371_vm15, %v2174_v16, %v368_v63  ;;  %v417_v17 = vsub.f32 1.5, %v416_v5  ;;  %vm549_vm4 = vweird.f32 %v2157_v10 }
  0xf1   : > { %v428_v62 = vmul.f32 %v2196_v26, %v427_v3  ;;  %v554_v11 = vmul.f32 %v372_v14, %v2027_v20  ;;  %v547_v51 = vsub.f32 1.5, %v546_v34  ;;  %v394_v13 = vmul.f32 %v2257_v9, %v2201_v31  ;;  %649 = vst.msk [vmem:[#allocation2] sm:$0xff] %vm320_vm0, %v553_v15  ;;  %vm551_vm6 = vmor %vm549_vm4, %vm550_vm3 }
  0xf2   : > { %1397 = vmatpush.xpose.msk.msra.mxu3 %vm320_vm0, %v671_v21  ;;  %v418_v16 = vmul.f32 %v2210_v42, %v417_v17  ;;  %1529 = vrsqrt.f32 %v2265_v12  ;;  %vm399_vm7 = vweird.f32 %v2201_v31  ;;  %vm400_vm8 = vweird.f32 %v2257_v9 }
  0xf3   : > { %v432_v19 = vsel %vm431_vm2, %v2196_v26, %v428_v62  ;;  %v2284_v20 = vpop.eup %1525  ;;  %650 = vst.msk [vmem:[#allocation2 + $0x10] sm:$0xff] %vm320_vm0, %v554_v11  ;;  %v548_v23 = vmul.f32 %v2222_v48, %v547_v51  ;;  %v395_v24 = vmul.f32 %v2257_v9, %v394_v13  ;;  %v2295_v26 = vmul.f32 %v2120_v46, %v553_v15  ;;  %vm401_vm9 = vmor %vm399_vm7, %vm400_vm8  ;;  %v931_v62 = vld [vmem:[#allocation9] sm:$0xff] }
  0xf4   : > { %v560_v56 = vmul.f32 %v432_v19, %v2039_v27  ;;  %v1528_v10 = vpop.eup %1527  ;;  %v422_v30 = vsel %vm421_vm5, %v2210_v42, %v418_v16  ;;  %v524_v27 = vmul.f32 %v2284_v20, %v2217_v44  ;;  %v2308_v32 = vmul.f32 %v2168_v58, %v554_v11 }
  0xf5   : > { %1395 = vmatmul.msk.f32.gmra.mxu2 %vm320_vm0, %v2172_v6  ;;  %1398 = vmatmul.msk.f32.vlgmr.msra.gmra.mxu3 %vm320_vm0, %v671_v21  ;;  %v2305_v4 = vld [vmem:[#allocation2 + $0x68] sm:$0xff]  ;;  %v559_v46 = vmul.f32 %v422_v30, %v2045_v29  ;;  %v552_v35 = vsel %vm551_vm6, %v2222_v48, %v548_v23  ;;  %v396_v39 = vmul.f32 0.5, %v395_v24  ;;  %v514_v40 = vmul.f32 %v1528_v10, %v2219_v47 }
  0xf6   : > { %656 = vst.msk [vmem:[#allocation2 + $0x70] sm:$0xff] %vm320_vm0, %v560_v56  ;;  %1408 = vmatpush.xpose.msk.msrb.mxu2 %vm320_vm0, %v2305_v4  ;;  %v568_v6 = vmul.f32 %v552_v35, %v2042_v28  ;;  %v525_v41 = vmul.f32 %v2284_v20, %v524_v27  ;;  %vm529_vm10 = vweird.f32 %v2217_v44  ;;  %vm530_vm11 = vweird.f32 %v2284_v20  ;;  %v914_v23 = vld [vmem:[#allocation8 + $0x8] sm:$0xff]  ;;  %v932_v35 = vld [vmem:[#allocation9 + $0x8] sm:$0xff] }
  0xf7   : > { %655 = vst.msk [vmem:[#allocation2 + $0x60] sm:$0xff] %vm320_vm0, %v559_v46  ;;  %v397_v58 = vsub.f32 1.5, %v396_v39  ;;  %v515_v29 = vmul.f32 %v1528_v10, %v514_v40  ;;  %v2325_v49 = vmul.f32 %v2229_v52, %v559_v46  ;;  %vm520_vm12 = vweird.f32 %v1528_v10  ;;  %vm531_vm13 = vmor %vm529_vm10, %vm530_vm11 }
  0xf8   : > { %v1530_v42 = vpop.eup %1529  ;;  %664 = vst.msk [vmem:[#allocation2 + $0x78] sm:$0xff] %vm320_vm0, %v568_v6  ;;  %v526_v43 = vmul.f32 0.5, %v525_v41  ;;  %v2322_v48 = vmul.f32 %v568_v6, %v560_v56  ;;  %v665_v22 = vld [vmem:[#allocation2] sm:$0xff]  ;;  %vm519_vm14 = vweird.f32 %v2219_v47  ;;  %vm409_vm1 = vweird.f32 %v2265_v12 }
  0xf9   : > { %v398_v28 = vmul.f32 %v2257_v9, %v397_v58  ;;  %v516_v0 = vmul.f32 0.5, %v515_v29  ;;  %v404_v50 = vmul.f32 %v1530_v42, %v2265_v12  ;;  %1385 = vmatpush.xpose.msk.msra.mxu0 %vm320_vm0, %v665_v22  ;;  %vm521_vm15 = vmor %vm519_vm14, %vm520_vm12  ;;  %vm410_vm2 = vweird.f32 %v1530_v42 }
  0xfa   : > { %v527_v31 = vsub.f32 1.5, %v526_v43  ;;  %v667_v1 = vld [vmem:[#allocation2 + $0x10] sm:$0xff]  ;;  %vm411_vm3 = vmor %vm409_vm1, %vm410_vm2  ;;  %vm949_vm4 = vcmask 130048  }
  0xfb   : > { %v402_v53 = vsel %vm401_vm9, %v2257_v9, %v398_v28  ;;  %v517_v54 = vsub.f32 1.5, %v516_v0  ;;  %v405_v52 = vmul.f32 %v1530_v42, %v404_v50  ;;  %1389 = vmatpush.xpose.msk.msra.mxu1 %vm320_vm0, %v667_v1 }
  0xfc   : > { %v557_v2 = vmul.f32 %v402_v53, %v2057_v36  ;;  %v528_v55 = vmul.f32 %v2284_v20, %v527_v31  ;;  %1386 = vmatmul.msk.f32.vlgmr.msra.gmra.mxu0 %vm320_vm0, %v665_v22 }
  0xfd   : > { %1399 = vmatmul.msk.f32.gmra.mxu3 %vm320_vm0, %v2237_v59  ;;  %v518_v44 = vmul.f32 %v1528_v10, %v517_v54  ;;  %v406_v18 = vmul.f32 0.5, %v405_v52  ;;  %v679_v57 = vld [vmem:[#allocation2 + $0x70] sm:$0xff] }
  0xfe   : > { %653 = vst.msk [vmem:[#allocation2 + $0x40] sm:$0xff] %vm320_vm0, %v557_v2  ;;  %v532_v60 = vsel %vm531_vm13, %v2284_v20, %v528_v55  ;;  %1390 = vmatmul.msk.f32.vlgmr.msra.gmra.mxu1 %vm320_vm0, %v667_v1  ;;  %v677_v36 = vld [vmem:[#allocation2 + $0x60] sm:$0xff] }
  0xff   : > { %v566_v63 = vmul.f32 %v532_v60, %v2063_v38  ;;  %v522_v59 = vsel %vm521_vm15, %v1528_v10, %v518_v44  ;;  %v407_v3 = vsub.f32 1.5, %v406_v18  ;;  %1409 = vmatpush.xpose.msk.msrb.mxu2 %vm320_vm0, %v677_v36  ;;  %v680_v47 = vld [vmem:[#allocation2 + $0x78] sm:$0xff] }
 0x100   : > { %v565_v5 = vmul.f32 %v522_v59, %v2060_v37  ;;  %1412 = vmatpush.xpose.msk.msrb.mxu3 %vm320_vm0, %v680_v47 }
 0x101   : > { %662 = vst.msk [vmem:[#allocation2 + $0x58] sm:$0xff] %vm320_vm0, %v566_v63  ;;  %v408_v8 = vmul.f32 %v1530_v42, %v407_v3 }
 0x102   : > { %661 = vst.msk [vmem:[#allocation2 + $0x48] sm:$0xff] %vm320_vm0, %v565_v5  ;;  %1410 = vmatmul.msk.f32.vlgmr.msrb.gmra.mxu2 %vm320_vm0, %v677_v36  ;;  %v2351_v9 = vmul.f32 %v565_v5, %v557_v2 }
 0x103   : > { %v412_v38 = vsel %vm411_vm3, %v1530_v42, %v408_v8 }
 0x104   : > { %v558_v34 = vmul.f32 %v412_v38, %v2075_v45  ;;  %1413 = vmatpush.xpose.msk.msrb.mxu3 %vm320_vm0, %v679_v57  ;;  %1387 = vmatmul.msk.f32.gmra.mxu0 %vm320_vm0, %v2182_v7 }
 0x105   : > { %v673_v45 = vld [vmem:[#allocation2 + $0x40] sm:$0xff] }
 0x106   : > { %654 = vst.msk [vmem:[#allocation2 + $0x50] sm:$0xff] %vm320_vm0, %v558_v34  ;;  %1391 = vmatmul.msk.f32.gmra.mxu1 %vm320_vm0, %v2245_v61  ;;  %v2360_v37 = vmul.f32 %v566_v63, %v558_v34  ;;  %v913_v61 = vld [vmem:[#allocation8] sm:$0xff] }
 0x107   : > { %1414 = vmatmul.msk.f32.vlgmr.msrb.gmra.mxu3 %vm320_vm0, %v679_v57 }
 0x108   : > { %v676_v12 = vld [vmem:[#allocation2 + $0x58] sm:$0xff] }
 0x109   : > { %v674_v14 = vld [vmem:[#allocation2 + $0x48] sm:$0xff]  ;;  %1404 = vmatpush.xpose.msk.msrb.mxu1 %vm320_vm0, %v676_v12 }
 0x10a   : > { %1400 = vmatpush.xpose.msk.msrb.mxu0 %vm320_vm0, %v674_v14  ;;  %1411 = vmatmul.msk.f32.gmra.mxu2 %vm320_vm0, %v2305_v4 }
 0x10d   : > { %v675_v7 = vld [vmem:[#allocation2 + $0x50] sm:$0xff] }
 0x10e   : > { %1401 = vmatpush.xpose.msk.msrb.mxu0 %vm320_vm0, %v673_v45  ;;  %1405 = vmatpush.xpose.msk.msrb.mxu1 %vm320_vm0, %v675_v7 }
 0x10f   : > { %1415 = vmatmul.msk.f32.gmra.mxu3 %vm320_vm0, %v680_v47 }
 0x111   : > { %1402 = vmatmul.msk.f32.vlgmr.msrb.gmra.mxu0 %vm320_vm0, %v673_v45  ;;  %1406 = vmatmul.msk.f32.vlgmr.msrb.gmra.mxu1 %vm320_vm0, %v675_v7 }
 0x119   : > { %1403 = vmatmul.msk.f32.gmra.mxu0 %vm320_vm0, %v674_v14  ;;  %1407 = vmatmul.msk.f32.gmra.mxu1 %vm320_vm0, %v676_v12 }
 0x170   : > { %v762_v15 = vpop.f32.mrf.mxu2 }
 0x171   : > { %v919_v17 = vmul.f32 %v913_v61, %v762_v15 }
 0x173   : > { %v2374_v21 = vadd.f32 %v931_v62, %v919_v17 }
 0x175   : > { %v962_v11 = vsel %vm949_vm4, %v2374_v21, -inf }
 0x176   : > { %963 = vmax.xlane.f32.xlu2 %v962_v11 }
 0x178   : > { %v791_v51 = vpop.f32.mrf.mxu3  ;;  %v765_v56 = vpop.f32.mrf.mxu2 }
 0x179   : > { %v704_v13 = vpop.f32.mrf.mxu0  ;;  %v921_v30 = vmul.f32 %v913_v61, %v791_v51  ;;  %v920_v4 = vmul.f32 %v914_v23, %v765_v56 }
 0x17a   : > { %v915_v19 = vmul.f32 %v913_v61, %v704_v13 }
 0x17b   : > { %v733_v16 = vpop.f32.mrf.mxu1  ;;  %v2386_v41 = vadd.f32 %v931_v62, %v921_v30  ;;  %v2388_v29 = vadd.f32 %v932_v35, %v920_v4 }
 0x17c   : > { %v917_v20 = vmul.f32 %v913_v61, %v733_v16  ;;  %v2378_v24 = vadd.f32 %v931_v62, %v915_v19 }
 0x17d   : > { %v968_v0 = vsel %vm949_vm4, %v2386_v41, -inf  ;;  %v965_v22 = vsel %vm949_vm4, %v2388_v29, -inf }
 0x17e   : > { %v2380_v10 = vadd.f32 %v931_v62, %v917_v20  ;;  %v950_v27 = vsel %vm949_vm4, %v2378_v24, -inf }
 0x17f   : > { %951 = vmax.xlane.f32.xlu1 %v950_v27  ;;  %v580_v27 = vsel %vm320_vm0, %v2308_v32, 0.0 }
 0x180   : > { %v956_v46 = vsel %vm949_vm4, %v2380_v10, -inf  ;;  %v794_v6 = vpop.f32.mrf.mxu3 }
 0x181   : > { %957 = vmax.xlane.f32.xlu0 %v956_v46  ;;  %v707_v39 = vpop.f32.mrf.mxu0  ;;  %v922_v43 = vmul.f32 %v914_v23, %v794_v6 }
 0x182   : > { %v916_v40 = vmul.f32 %v914_v23, %v707_v39 }
 0x183   : > { %v736_v58 = vpop.f32.mrf.mxu1  ;;  %v2398_v1 = vadd.f32 %v932_v35, %v922_v43 }
 0x184   : > { %v2390_v42 = vadd.f32 %v932_v35, %v916_v40  ;;  %v918_v28 = vmul.f32 %v914_v23, %v736_v58 }
 0x185   : > { %v878_v31 = vpop.f32.mrf.mxu2  ;;  %v971_v52 = vsel %vm949_vm4, %v2398_v1, -inf }
 0x186   : > { %v953_v50 = vsel %vm949_vm4, %v2390_v42, -inf  ;;  %v2400_v53 = vadd.f32 %v932_v35, %v918_v28  ;;  %v927_v55 = vmul.f32 %v913_v61, %v878_v31 }
 0x187   : > { %969 = vmax.xlane.f32.xlu1 %v968_v0  ;;  %954 = vmax.xlane.f32.xlu2 %v953_v50 }
 0x188   : > { %v959_v18 = vsel %vm949_vm4, %v2400_v53, -inf  ;;  %v2412_v5 = vadd.f32 %v931_v62, %v927_v55 }
 0x189   : > { %966 = vmax.xlane.f32.xlu0 %v965_v22 }
 0x18a   : > { %v907_v36 = vpop.f32.mrf.mxu3  ;;  %v986_v14 = vsel %vm949_vm4, %v2412_v5, -inf }
 0x18b   : > { %v929_v3 = vmul.f32 %v913_v61, %v907_v36 }
 0x18d   : > { %v881_v8 = vpop.f32.mrf.mxu2  ;;  %v2418_v45 = vadd.f32 %v931_v62, %v929_v3 }
 0x18e   : > { %v820_v54 = vpop.f32.mrf.mxu0  ;;  %v849_v2 = vpop.f32.mrf.mxu1  ;;  %v928_v34 = vmul.f32 %v914_v23, %v881_v8 }
 0x18f   : > { %v923_v44 = vmul.f32 %v913_v61, %v820_v54  ;;  %v925_v60 = vmul.f32 %v913_v61, %v849_v2  ;;  %960 = vmax.xlane.f32.xlu1 %v959_v18  ;;  %972 = vmax.xlane.f32.xlu2 %v971_v52  ;;  %v992_v15 = vsel %vm949_vm4, %v2418_v45, -inf }
 0x190   : > { %v2424_v11 = vadd.f32 %v932_v35, %v928_v34 }
 0x191   : > { %v2406_v63 = vadd.f32 %v931_v62, %v923_v44  ;;  %v2408_v59 = vadd.f32 %v931_v62, %v925_v60 }
 0x192   : > { %v910_v51 = vpop.f32.mrf.mxu3  ;;  %v989_v62 = vsel %vm949_vm4, %v2424_v11, -inf }
 0x193   : > { %v974_v47 = vsel %vm949_vm4, %v2406_v63, -inf  ;;  %v980_v38 = vsel %vm949_vm4, %v2408_v59, -inf  ;;  %v930_v13 = vmul.f32 %v914_v23, %v910_v51 }
 0x194   : > { %975 = vmax.xlane.f32.xlu0 %v974_v47 }
 0x195   : > { %v2434_v56 = vadd.f32 %v932_v35, %v930_v13 }
 0x196   : > { %v823_v57 = vpop.f32.mrf.mxu0  ;;  %v852_v7 = vpop.f32.mrf.mxu1 }
 0x197   : > { %v924_v12 = vmul.f32 %v914_v23, %v823_v57  ;;  %987 = vmax.xlane.f32.xlu1 %v986_v14  ;;  %981 = vmax.xlane.f32.xlu2 %v980_v38  ;;  %v926_v61 = vmul.f32 %v914_v23, %v852_v7  ;;  %v995_v30 = vsel %vm949_vm4, %v2434_v56, -inf  ;;  %v577_v23 = vsel %vm320_vm0, %v2295_v26, 0.0 }
 0x199   : > { %v2422_v17 = vadd.f32 %v932_v35, %v924_v12  ;;  %v2430_v16 = vadd.f32 %v932_v35, %v926_v61 }
 0x19b   : > { %v977_v19 = vsel %vm949_vm4, %v2422_v17, -inf  ;;  %v983_v20 = vsel %vm949_vm4, %v2430_v16, -inf }
 0x19c   : > { %993 = vmax.xlane.f32.xlu0 %v992_v15 }
 0x19f   : > { %978 = vmax.xlane.f32.xlu1 %v977_v19  ;;  %990 = vmax.xlane.f32.xlu2 %v989_v62 }
 0x1a4   : > { %984 = vmax.xlane.f32.xlu0 %v983_v20 }
 0x1a7   : > { %996 = vmax.xlane.f32.xlu1 %v995_v30  ;;  %578 = vadd.xlane.f32.xlu2 %v577_v23 }
 0x1af   : > { %581 = vadd.xlane.f32.xlu1 %v580_v27 }
 0x1e9   : > { %v2442_v4 = vpop.xlane.xlu2 %963 }
 0x1ea   : > { %v1002_v46 = vsub.f32 %v2374_v21, %v2442_v4 }
 0x1ec   : > { %v1022_v35 = vmul.f32 1.442695, %v1002_v46 }
 0x1ee   : > { %1531 = vpow2.f32 %v1022_v35 }
 0x1f2   : > { %v2446_v40 = vpop.xlane.xlu1 %951 }
 0x1f3   : > { %v998_v6 = vsub.f32 %v2378_v24, %v2446_v40 }
 0x1f4   : > { %v1532_v39 = vpop.eup %1531  ;;  %v2450_v26 = vpop.xlane.xlu0 %957 }
 0x1f5   : > { %v1058_v58 = vsel %vm949_vm4, %v1532_v39, 0.0  ;;  %v1000_v32 = vsub.f32 %v2380_v10, %v2450_v26  ;;  %v1014_v43 = vmul.f32 1.442695, %v998_v6 }
 0x1f6   : > { %1059 = vadd.xlane.f32.xlu1 %v1058_v58 }
 0x1f7   : > { %v1018_v28 = vmul.f32 1.442695, %v1000_v32  ;;  %1533 = vpow2.f32 %v1014_v43 }
 0x1f9   : > { %1535 = vpow2.f32 %v1018_v28 }
 0x1fa   : > { %v2455_v21 = vpop.xlane.xlu1 %969  ;;  %v2457_v0 = vpop.xlane.xlu2 %954 }
 0x1fb   : > { %v1004_v50 = vsub.f32 %v2386_v41, %v2455_v21  ;;  %v999_v24 = vsub.f32 %v2390_v42, %v2457_v0 }
 0x1fc   : > { %v2463_v22 = vpop.xlane.xlu0 %966 }
 0x1fd   : > { %v1003_v10 = vsub.f32 %v2388_v29, %v2463_v22  ;;  %v1534_v31 = vpop.eup %1533  ;;  %v1026_v54 = vmul.f32 1.442695, %v1004_v50  ;;  %v1016_v52 = vmul.f32 1.442695, %v999_v24 }
 0x1fe   : > { %v1046_v44 = vsel %vm949_vm4, %v1534_v31, 0.0 }
 0x1ff   : > { %v1536_v2 = vpop.eup %1535  ;;  %v1024_v55 = vmul.f32 1.442695, %v1003_v10  ;;  %1537 = vpow2.f32 %v1026_v54  ;;  %1047 = vadd.xlane.f32.xlu0 %v1046_v44 }
 0x200   : > { %v1052_v18 = vsel %vm949_vm4, %v1536_v2, 0.0  ;;  %1539 = vpow2.f32 %v1016_v52 }
 0x201   : > { %1053 = vadd.xlane.f32.xlu2 %v1052_v18  ;;  %1541 = vpow2.f32 %v1024_v55 }
 0x202   : > { %v2469_v41 = vpop.xlane.xlu1 %960  ;;  %v2471_v42 = vpop.xlane.xlu2 %972 }
 0x203   : > { %v1001_v29 = vsub.f32 %v2400_v53, %v2469_v41  ;;  %v1005_v60 = vsub.f32 %v2398_v1, %v2471_v42 }
 0x205   : > { %v1538_v36 = vpop.eup %1537  ;;  %v1020_v3 = vmul.f32 1.442695, %v1001_v29  ;;  %v1028_v47 = vmul.f32 1.442695, %v1005_v60 }
 0x206   : > { %v1540_v8 = vpop.eup %1539  ;;  %v1064_v57 = vsel %vm949_vm4, %v1538_v36, 0.0 }
 0x207   : > { %v2477_v38 = vpop.xlane.xlu0 %975  ;;  %v1542_v34 = vpop.eup %1541  ;;  %1543 = vpow2.f32 %v1020_v3  ;;  %v1049_v14 = vsel %vm949_vm4, %v1540_v8, 0.0  ;;  %1065 = vadd.xlane.f32.xlu0 %v1064_v57  ;;  %v583_v8 = vsel %vm320_vm0, %v2194_v25, 0.0  ;;  %v586_v57 = vsel %vm320_vm0, %v2203_v33, 0.0 }
 0x208   : > { %v1006_v12 = vsub.f32 %v2406_v63, %v2477_v38  ;;  %1545 = vpow2.f32 %v1028_v47  ;;  %1050 = vadd.xlane.f32.xlu1 %v1049_v14  ;;  %v1061_v1 = vsel %vm949_vm4, %v1542_v34, 0.0  ;;  %v598_v34 = vsel %vm320_vm0, %v2322_v48, 0.0 }
 0x209   : > { %1062 = vadd.xlane.f32.xlu2 %v1061_v1 }
 0x20a   : > { %v1030_v53 = vmul.f32 1.442695, %v1006_v12  ;;  %v2484_v7 = vpop.xlane.xlu1 %987  ;;  %v2486_v61 = vpop.xlane.xlu2 %981  ;;  %v592_v12 = vsel %vm320_vm0, %v2360_v37, 0.0 }
 0x20b   : > { %v1010_v15 = vsub.f32 %v2412_v5, %v2484_v7  ;;  %v1008_v63 = vsub.f32 %v2408_v59, %v2486_v61 }
 0x20c   : > { %1547 = vpow2.f32 %v1030_v53 }
 0x20d   : > { %v1544_v51 = vpop.eup %1543  ;;  %v1038_v13 = vmul.f32 1.442695, %v1010_v15  ;;  %v1034_v19 = vmul.f32 1.442695, %v1008_v63 }
 0x20e   : > { %v1546_v62 = vpop.eup %1545  ;;  %v1055_v30 = vsel %vm949_vm4, %v1544_v51, 0.0  ;;  %v1801_v51 = vmov 16.0  }
 0x20f   : > { %v2492_v20 = vpop.xlane.xlu0 %993  ;;  %1549 = vpow2.f32 %v1038_v13  ;;  %v1067_v27 = vsel %vm949_vm4, %v1546_v62, 0.0  ;;  %1056 = vadd.xlane.f32.xlu0 %v1055_v30 }
 0x210   : > { %v1012_v23 = vsub.f32 %v2418_v45, %v2492_v20  ;;  %1551 = vpow2.f32 %v1034_v19  ;;  %1068 = vadd.xlane.f32.xlu1 %v1067_v27 }
 0x212   : > { %v1548_v5 = vpop.eup %1547  ;;  %v1042_v46 = vmul.f32 1.442695, %v1012_v23  ;;  %v2498_v59 = vpop.xlane.xlu1 %978 }
 0x213   : > { %v2500_v35 = vpop.xlane.xlu2 %990  ;;  %v1070_v39 = vsel %vm949_vm4, %v1548_v5, 0.0  ;;  %v1007_v6 = vsub.f32 %v2422_v17, %v2498_v59 }
 0x214   : > { %1553 = vpow2.f32 %v1042_v46  ;;  %v1011_v45 = vsub.f32 %v2424_v11, %v2500_v35  ;;  %1071 = vadd.xlane.f32.xlu2 %v1070_v39 }
 0x215   : > { %v1550_v58 = vpop.eup %1549  ;;  %v1032_v32 = vmul.f32 1.442695, %v1007_v6 }
 0x216   : > { %v1040_v43 = vmul.f32 1.442695, %v1011_v45  ;;  %v1552_v28 = vpop.eup %1551  ;;  %v1082_v24 = vsel %vm949_vm4, %v1550_v58, 0.0 }
 0x217   : > { %v2507_v50 = vpop.xlane.xlu0 %984  ;;  %1555 = vpow2.f32 %v1032_v32  ;;  %v1076_v31 = vsel %vm949_vm4, %v1552_v28, 0.0  ;;  %1083 = vadd.xlane.f32.xlu0 %v1082_v24 }
 0x218   : > { %v1009_v10 = vsub.f32 %v2430_v16, %v2507_v50  ;;  %1557 = vpow2.f32 %v1040_v43  ;;  %1077 = vadd.xlane.f32.xlu1 %v1076_v31 }
 0x21a   : > { %v1554_v17 = vpop.eup %1553  ;;  %v1036_v11 = vmul.f32 1.442695, %v1009_v10  ;;  %v2513_v54 = vpop.xlane.xlu1 %996 }
 0x21b   : > { %v1088_v52 = vsel %vm949_vm4, %v1554_v17, 0.0  ;;  %v1013_v2 = vsub.f32 %v2434_v56, %v2513_v54  ;;  %v589_v56 = vsel %vm320_vm0, %v2351_v9, 0.0  ;;  %v595_v9 = vsel %vm320_vm0, %v2325_v49, 0.0  ;;  %v579_v14 = vpop.xlane.xlu2 %578 }
 0x21c   : > { %1559 = vpow2.f32 %v1036_v11  ;;  %1089 = vadd.xlane.f32.xlu2 %v1088_v52  ;;  %v601_v63 = vrot.slane %v579_v14, 4 }
 0x21d   : > { %v1556_v55 = vpop.eup %1555  ;;  %v1044_v44 = vmul.f32 1.442695, %v1013_v2 }
 0x21e   : > { %v1558_v18 = vpop.eup %1557  ;;  %v1073_v16 = vsel %vm949_vm4, %v1556_v55, 0.0  ;;  %v602_v19 = vadd.f32 %v601_v63, %v579_v14 }
 0x21f   : > { %1561 = vpow2.f32 %v1044_v44  ;;  %v1085_v29 = vsel %vm949_vm4, %v1558_v18, 0.0  ;;  %1074 = vadd.xlane.f32.xlu0 %v1073_v16 }
 0x220   : > { %1086 = vadd.xlane.f32.xlu1 %v1085_v29  ;;  %v603_v46 = vrot.slane %v602_v19, 2 }
 0x222   : > { %v1560_v60 = vpop.eup %1559  ;;  %v582_v1 = vpop.xlane.xlu1 %581  ;;  %v604_v17 = vadd.f32 %v603_v46, %v602_v19 }
 0x223   : > { %v1079_v36 = vsel %vm949_vm4, %v1560_v60, 0.0  ;;  %v607_v23 = vrot.slane %v582_v1, 4 }
 0x224   : > { %1080 = vadd.xlane.f32.xlu2 %v1079_v36 }
 0x225   : > { %v1562_v3 = vpop.eup %1561  ;;  %v608_v10 = vadd.f32 %v607_v23, %v582_v1 }
 0x226   : > { %v1091_v47 = vsel %vm949_vm4, %v1562_v3, 0.0 }
 0x227   : > { %1092 = vadd.xlane.f32.xlu0 %v1091_v47  ;;  %v609_v36 = vrot.slane %v608_v10, 2 }
 0x228   : > { %590 = vadd.xlane.f32.xlu1 %v589_v56 }
 0x22c   : > { %584 = vadd.xlane.f32.xlu2 %v583_v8 }
 0x22f   : > { %587 = vadd.xlane.f32.xlu0 %v586_v57 }
 0x230   : > { %599 = vadd.xlane.f32.xlu1 %v598_v34 }
 0x234   : > { %593 = vadd.xlane.f32.xlu2 %v592_v12 }
 0x237   : > { %596 = vadd.xlane.f32.xlu0 %v595_v9 }
 0x269   : > { %v1060_v53 = vpop.xlane.xlu1 %1059 }
 0x272   : > { %v1048_v25 = vpop.xlane.xlu0 %1047 }
 0x273   : > { %1563 = vlog2.f32 %v1048_v25 }
 0x274   : > { %v1054_v15 = vpop.xlane.xlu2 %1053  ;;  %1565 = vrcp.f32 %v1801_v51 }
 0x279   : > { %v1564_v37 = vpop.eup %1563 }
 0x27a   : > { %v1066_v33 = vpop.xlane.xlu0 %1065  ;;  %v2534_v49 = vpop.eup %1565  ;;  %v1095_v62 = vmul.f32 0.6931472, %v1564_v37 }
 0x27b   : > { %v1051_v48 = vpop.xlane.xlu1 %1050  ;;  %v1215_v58 = vmul.f32 16.0, %v2534_v49  ;;  %vm1219_vm0 = vweird.f32 %v2534_v49 }
 0x27c   : > { %1567 = vlog2.f32 %v1051_v48  ;;  %v1063_v13 = vpop.xlane.xlu2 %1062  ;;  %v1126_v43 = vadd.f32 %v1095_v62, %v2446_v40  ;;  %v605_v40 = vrot.slane %v604_v17, 1 }
 0x27d   : > { %1569 = vlog2.f32 %v1063_v13  ;;  %v1216_v44 = vsub.f32 1.0, %v1215_v58 }
 0x27e   : > { %1571 = vlog2.f32 %v1060_v53 }
 0x27f   : > { %1573 = vlog2.f32 %v1054_v15  ;;  %v1217_v12 = vmul.f32 %v2534_v49, %v1216_v44 }
 0x280   : > { %1575 = vlog2.f32 %v1066_v33  ;;  %v606_v33 = vadd.f32 %v605_v40, %v604_v17 }
 0x281   : > { %v1218_v51 = vadd.f32 %v2534_v49, %v1217_v12 }
 0x282   : > { %v1568_v30 = vpop.eup %1567  ;;  %v1057_v27 = vpop.xlane.xlu0 %1056  ;;  %v1198_v23 = vmul.f32 110.0, %v606_v33 }
 0x283   : > { %v1570_v5 = vpop.eup %1569  ;;  %v1097_v39 = vmul.f32 0.6931472, %v1568_v30  ;;  %v1069_v6 = vpop.xlane.xlu1 %1068  ;;  %1577 = vlog2.f32 %v1057_v27  ;;  %v2552_v46 = vsel %vm1219_vm0, %v2534_v49, %v1218_v51 }
 0x284   : > { %v1572_v45 = vpop.eup %1571  ;;  %1579 = vlog2.f32 %v1069_v6  ;;  %v1105_v24 = vmul.f32 0.6931472, %v1570_v5 }
 0x285   : > { %v1574_v32 = vpop.eup %1573  ;;  %v1127_v28 = vadd.f32 %v1097_v39, %v2457_v0  ;;  %v1103_v11 = vmul.f32 0.6931472, %v1572_v45 }
 0x286   : > { %v1576_v2 = vpop.eup %1575  ;;  %v1099_v55 = vmul.f32 0.6931472, %v1574_v32  ;;  %v1131_v29 = vadd.f32 %v1105_v24, %v2463_v22  ;;  %v610_v22 = vadd.f32 %v609_v36, %v608_v10 }
 0x287   : > { %v1072_v31 = vpop.xlane.xlu2 %1071  ;;  %v1142_v52 = vadd.f32 %v1127_v28, %v1126_v43  ;;  %v1130_v0 = vadd.f32 %v1103_v11, %v2442_v4  ;;  %v1107_v25 = vmul.f32 0.6931472, %v1576_v2 }
 0x288   : > { %v1128_v34 = vadd.f32 %v1099_v55, %v2450_v26  ;;  %1581 = vlog2.f32 %v1072_v31  ;;  %v611_v37 = vrot.slane %v610_v22, 1 }
 0x289   : > { %v1578_v18 = vpop.eup %1577  ;;  %v1143_v16 = vrot.slane %v1142_v52, 4  ;;  %v1156_v1 = vadd.f32 %v1131_v29, %v1130_v0 }
 0x28a   : > { %v1580_v60 = vpop.eup %1579  ;;  %v1101_v3 = vmul.f32 0.6931472, %v1578_v18  ;;  %v1084_v47 = vpop.xlane.xlu0 %1083  ;;  %v612_v45 = vadd.f32 %v611_v37, %v610_v22 }
 0x28b   : > { %v1144_v56 = vadd.f32 %v1143_v16, %v1142_v52  ;;  %v1109_v8 = vmul.f32 0.6931472, %v1580_v60  ;;  %v1078_v57 = vpop.xlane.xlu1 %1077  ;;  %v1157_v13 = vrot.slane %v1156_v1, 4  ;;  %1583 = vlog2.f32 %v1084_v47 }
 0x28c   : > { %v1129_v9 = vadd.f32 %v1101_v3, %v2469_v41  ;;  %v1132_v41 = vadd.f32 %v1107_v25, %v2455_v21  ;;  %1585 = vlog2.f32 %v1078_v57  ;;  %v1199_v2 = vmul.f32 110.0, %v612_v45 }
 0x28d   : > { %v1145_v14 = vrot.slane %v1144_v56, 2  ;;  %v1133_v4 = vadd.f32 %v1109_v8, %v2471_v42  ;;  %v1158_v6 = vadd.f32 %v1157_v13, %v1156_v1 }
 0x28e   : > { %v1149_v53 = vadd.f32 %v1129_v9, %v1128_v34  ;;  %v1582_v30 = vpop.eup %1581 }
 0x28f   : > { %v1090_v15 = vpop.xlane.xlu2 %1089  ;;  %v1146_v63 = vadd.f32 %v1145_v14, %v1144_v56  ;;  %v1163_v5 = vadd.f32 %v1133_v4, %v1132_v41  ;;  %v1111_v32 = vmul.f32 0.6931472, %v1582_v30  ;;  %v1159_v49 = vrot.slane %v1158_v6, 2 }
 0x290   : > { %v1150_v26 = vrot.slane %v1149_v53, 4 }
 0x291   : > { %v1147_v48 = vrot.slane %v1146_v63, 1  ;;  %v1584_v28 = vpop.eup %1583  ;;  %v1164_v10 = vrot.slane %v1163_v5, 4  ;;  %v1134_v44 = vadd.f32 %v1111_v32, %v2477_v38  ;;  %v1160_v34 = vadd.f32 %v1159_v49, %v1158_v6 }
 0x292   : > { %v1151_v19 = vadd.f32 %v1150_v26, %v1149_v53  ;;  %v1075_v62 = vpop.xlane.xlu0 %1074  ;;  %v1586_v31 = vpop.eup %1585  ;;  %v1119_v60 = vmul.f32 0.6931472, %v1584_v28 }
 0x293   : > { %v1148_v27 = vadd.f32 %v1147_v48, %v1146_v63  ;;  %v1087_v42 = vpop.xlane.xlu1 %1086  ;;  %1587 = vlog2.f32 %v1075_v62  ;;  %v1165_v29 = vadd.f32 %v1164_v10, %v1163_v5  ;;  %v1115_v0 = vmul.f32 0.6931472, %v1586_v31 }
 0x294   : > { %v1152_v39 = vrot.slane %v1151_v19, 2  ;;  %1589 = vlog2.f32 %v1087_v42  ;;  %v1138_v53 = vadd.f32 %v1119_v60, %v2484_v7  ;;  %v1161_v48 = vrot.slane %v1160_v34, 1 }
 0x295   : > { %v1206_v21 = vsub.f32 %v1148_v27, %v1198_v23  ;;  %1591 = vlog2.f32 %v1090_v15  ;;  %v1166_v22 = vrot.slane %v1165_v29, 2  ;;  %v1136_v63 = vadd.f32 %v1115_v0, %v2486_v61 }
 0x296   : > { %v1153_v58 = vadd.f32 %v1152_v39, %v1151_v19 }
 0x297   : > { %v1081_v43 = vpop.xlane.xlu2 %1080  ;;  %v1221_v24 = vmul.f32 %v2552_v46, %v1206_v21  ;;  %v1167_v23 = vadd.f32 %v1166_v22, %v1165_v29 }
 0x298   : > { %1593 = vlog2.f32 %v1081_v43  ;;  %v1154_v17 = vrot.slane %v1153_v58, 1 }
 0x299   : > { %v1588_v11 = vpop.eup %1587  ;;  %1229 = vst [vmem:[%s2555_s8] sm:$0x1] %v1221_v24 }
 0x29a   : > { %v1590_v52 = vpop.eup %1589  ;;  %v1155_v55 = vadd.f32 %v1154_v17, %v1153_v58  ;;  %v1113_v18 = vmul.f32 0.6931472, %v1588_v11  ;;  %v1093_v16 = vpop.xlane.xlu0 %1092  ;;  %v1162_v17 = vadd.f32 %v1161_v48, %v1160_v34 }
 0x29b   : > { %v1121_v36 = vmul.f32 0.6931472, %v1590_v52  ;;  %v591_v3 = vpop.xlane.xlu1 %590  ;;  %1595 = vlog2.f32 %v1093_v16  ;;  %v1592_v47 = vpop.eup %1591 }
 0x29c   : > { %v1207_v40 = vsub.f32 %v1155_v55, %v1199_v2  ;;  %v1135_v56 = vadd.f32 %v1113_v18, %v2498_v59  ;;  %v625_v8 = vrot.slane %v591_v3, 4  ;;  %v1123_v15 = vmul.f32 0.6931472, %v1592_v47 }
 0x29d   : > { %v1139_v12 = vadd.f32 %v1121_v36, %v2500_v35 }
 0x29e   : > { %v1594_v57 = vpop.eup %1593  ;;  %v1222_v38 = vmul.f32 %v2552_v46, %v1207_v40  ;;  %v1170_v9 = vadd.f32 %v1135_v56, %v1134_v44  ;;  %v626_v1 = vadd.f32 %v625_v8, %v591_v3  ;;  %v1140_v7 = vadd.f32 %v1123_v15, %v2492_v20 }
 0x29f   : > { %v1117_v14 = vmul.f32 0.6931472, %v1594_v57  ;;  %v585_v25 = vpop.xlane.xlu2 %584  ;;  %v1184_v35 = vadd.f32 %v1139_v12, %v1138_v53  ;;  %v1168_v44 = vrot.slane %v1167_v23, 1 }
 0x2a0   : > { %v613_v33 = vrot.slane %v585_v25, 4  ;;  %1230 = vst [vmem:[%s2555_s8 + $0x1] sm:$0x1] %v1222_v38  ;;  %v1171_v59 = vrot.slane %v1170_v9, 4  ;;  %v627_v51 = vrot.slane %v626_v1, 2 }
 0x2a1   : > { %v1137_v4 = vadd.f32 %v1117_v14, %v2507_v50  ;;  %v1596_v26 = vpop.eup %1595  ;;  %v1185_v6 = vrot.slane %v1184_v35, 4 }
 0x2a2   : > { %v614_v13 = vadd.f32 %v613_v33, %v585_v25  ;;  %v1172_v41 = vadd.f32 %v1171_v59, %v1170_v9  ;;  %v628_v19 = vadd.f32 %v627_v51, %v626_v1  ;;  %v1125_v62 = vmul.f32 0.6931472, %v1596_v26  ;;  %v588_v30 = vpop.xlane.xlu0 %587 }
 0x2a3   : > { %v1177_v37 = vadd.f32 %v1137_v4, %v1136_v63  ;;  %v600_v5 = vpop.xlane.xlu1 %599  ;;  %v619_v42 = vrot.slane %v588_v30, 4  ;;  %v1186_v60 = vadd.f32 %v1185_v6, %v1184_v35  ;;  %v1169_v9 = vadd.f32 %v1168_v44, %v1167_v23 }
 0x2a4   : > { %v615_v27 = vrot.slane %v614_v13, 2  ;;  %v1173_v61 = vrot.slane %v1172_v41, 2  ;;  %v629_v21 = vrot.slane %v628_v19, 1  ;;  %v1141_v50 = vadd.f32 %v1125_v62, %v2513_v54 }
 0x2a5   : > { %v1178_v39 = vrot.slane %v1177_v37, 4  ;;  %v643_v58 = vrot.slane %v600_v5, 4  ;;  %v620_v32 = vadd.f32 %v619_v42, %v588_v30  ;;  %v1187_v53 = vrot.slane %v1186_v60, 2 }
 0x2a6   : > { %v616_v45 = vadd.f32 %v615_v27, %v614_v13  ;;  %v1174_v43 = vadd.f32 %v1173_v61, %v1172_v41  ;;  %v630_v24 = vadd.f32 %v629_v21, %v628_v19  ;;  %v1191_v10 = vadd.f32 %v1141_v50, %v1140_v7 }
 0x2a7   : > { %v1179_v28 = vadd.f32 %v1178_v39, %v1177_v37  ;;  %v594_v31 = vpop.xlane.xlu2 %593  ;;  %v644_v20 = vadd.f32 %v643_v58, %v600_v5  ;;  %v621_v49 = vrot.slane %v620_v32, 2  ;;  %v1188_v19 = vadd.f32 %v1187_v53, %v1186_v60 }
 0x2a8   : > { %v617_v11 = vrot.slane %v616_v45, 1  ;;  %v1175_v2 = vrot.slane %v1174_v43, 1  ;;  %v1192_v55 = vrot.slane %v1191_v10, 4  ;;  %v631_v29 = vrot.slane %v594_v31, 4 }
 0x2a9   : > { %v1180_v52 = vrot.slane %v1179_v28, 2  ;;  %v645_v16 = vrot.slane %v644_v20, 2  ;;  %v622_v54 = vadd.f32 %v621_v49, %v620_v32  ;;  %v1202_v3 = vmul.f32 110.0, %v630_v24 }
 0x2aa   : > { %v618_v18 = vadd.f32 %v617_v11, %v616_v45  ;;  %v1176_v36 = vadd.f32 %v1175_v2, %v1174_v43  ;;  %v1193_v47 = vadd.f32 %v1192_v55, %v1191_v10  ;;  %v632_v8 = vadd.f32 %v631_v29, %v594_v31  ;;  %v597_v57 = vpop.xlane.xlu0 %596 }
 0x2ab   : > { %v646_v0 = vadd.f32 %v645_v16, %v644_v20  ;;  %v623_v56 = vrot.slane %v622_v54, 1  ;;  %v1181_v34 = vadd.f32 %v1180_v52, %v1179_v28  ;;  %v637_v63 = vrot.slane %v597_v57, 4 }
 0x2ac   : > { %v1200_v40 = vmul.f32 110.0, %v618_v18  ;;  %v1210_v12 = vsub.f32 %v1176_v36, %v1202_v3  ;;  %v1194_v38 = vrot.slane %v1193_v47, 2  ;;  %v633_v22 = vrot.slane %v632_v8, 2 }
 0x2ad   : > { %v647_v1 = vrot.slane %v646_v0, 1  ;;  %v624_v25 = vadd.f32 %v623_v56, %v622_v54  ;;  %v638_v48 = vadd.f32 %v637_v63, %v597_v57  ;;  %v1182_v41 = vrot.slane %v1181_v34, 1 }
 0x2ae   : > { %v1208_v14 = vsub.f32 %v1162_v17, %v1200_v40  ;;  %v1225_v15 = vmul.f32 %v2552_v46, %v1210_v12  ;;  %v1195_v33 = vadd.f32 %v1194_v38, %v1193_v47  ;;  %v634_v26 = vadd.f32 %v633_v22, %v632_v8 }
 0x2af   : > { %v648_v4 = vadd.f32 %v647_v1, %v646_v0  ;;  %v1201_v51 = vmul.f32 110.0, %v624_v25  ;;  %v639_v23 = vrot.slane %v638_v48, 2  ;;  %v1183_v61 = vadd.f32 %v1182_v41, %v1181_v34 }
 0x2b0   : > { %v1223_v59 = vmul.f32 %v2552_v46, %v1208_v14  ;;  %1233 = vst [vmem:[%s2555_s8 + $0x4] sm:$0x1] %v1225_v15  ;;  %v1196_v35 = vrot.slane %v1195_v33, 1  ;;  %v635_v37 = vrot.slane %v634_v26, 1  ;;  %v1189_v50 = vrot.slane %v1188_v19, 1 }
 0x2b1   : > { %v1209_v13 = vsub.f32 %v1169_v9, %v1201_v51  ;;  %v1205_v30 = vmul.f32 110.0, %v648_v4  ;;  %v640_v42 = vadd.f32 %v639_v23, %v638_v48 }
 0x2b2   : > { %1231 = vst [vmem:[%s2555_s8 + $0x2] sm:$0x1] %v1223_v59  ;;  %v1197_v62 = vadd.f32 %v1196_v35, %v1195_v33  ;;  %v636_v27 = vadd.f32 %v635_v37, %v634_v26  ;;  %v1190_v43 = vadd.f32 %v1189_v50, %v1188_v19 }
 0x2b3   : > { %v1224_v7 = vmul.f32 %v2552_v46, %v1209_v13  ;;  %v641_v6 = vrot.slane %v640_v42, 1 }
 0x2b4   : > { %v1213_v5 = vsub.f32 %v1197_v62, %v1205_v30  ;;  %v1203_v39 = vmul.f32 110.0, %v636_v27 }
 0x2b5   : > { %1232 = vst [vmem:[%s2555_s8 + $0x3] sm:$0x1] %v1224_v7  ;;  %v642_v58 = vadd.f32 %v641_v6, %v640_v42 }
 0x2b6   : > { %v1228_v21 = vmul.f32 %v2552_v46, %v1213_v5  ;;  %v1211_v45 = vsub.f32 %v1183_v61, %v1203_v39 }
 0x2b7   : > { %v1204_v28 = vmul.f32 110.0, %v642_v58 }
 0x2b8   : > { %1236 = vst [vmem:[%s2555_s8 + $0x7] sm:$0x1] %v1228_v21  ;;  %v1226_v32 = vmul.f32 %v2552_v46, %v1211_v45 }
 0x2b9   : > { %v1212_v24 = vsub.f32 %v1190_v43, %v1204_v28 }
 0x2ba   : > { %1234 = vst [vmem:[%s2555_s8 + $0x5] sm:$0x1] %v1226_v32 }
 0x2bb   : > { %v1227_v10 = vmul.f32 %v2552_v46, %v1212_v24 }
 0x2bd   : > { %1235 = vst [vmem:[%s2555_s8 + $0x6] sm:$0x1] %v1227_v10 }
 0x2be   : > { %1744 = shalt.err (!%p1741_p11)
}
 0x2bf   : > { %s1802_s23 = smov 16   ;;  %s1803_s30 = smov 1  }
 0x2c0   : > { %1434 = dma.vmem_to_hbm [thread:$0]  (%p1901_p3), %s1250_s19, 128, %s1252_s28, %s1238_s9, %s1802_s23, %s1802_s23, %s1803_s30  }
 0x2c1 PF: > { %s1266_s6 = sand.u32 1, %s1783_s15   ;;  %p2636_p12 = scmp.ge.s32.totalorder %s1795_s18, 2 }
 0x2c2   : > { %s1267_s26 = scalar_lea.sflag [#allocation5], %s1266_s6 }
 0x2c3   : > { %p1451_p13 = pnand %p2636_p12, %p1864_p6 }
 0x2c5   : > { %p1452_p0 = pneg %p1451_p13 }
 0x2c7   : > { %1778 = dma.done.wait (%p1452_p0), %s1267_s26, 128  }
 0x2c8   : > { %1780 = vsyncadd (%p1452_p0), %s1267_s26, 4294967168  ;;  %p21_p5 = scmp.ge.s32.totalorder %s1891_s10, 4   ;;  %s2637_s15 = smov %s1787_s16 }
 0x2c9   : > { %s2638_s16 = smov %s1791_s17  ;;  %s2639_s17 = smov %s1907_s14 }
 0x2ca   : > { %s2640_s18 = smov %s1891_s10  ;;  %23 = sbr.rel (!%p21_p5) target bundleno = 12 (0xc), region = 102 }
 0x2cf   :  { %1273 = vsyncpa [#allocation4], 1 }
 0x2d0   :  { %1275 = vsyncpa [#allocation4 + $0x1], 1 }
 0x2d1   :  { %1276 = vsyncpa [#allocation7], 1 }
 0x2d2   :  { %1278 = vsyncpa [#allocation7 + $0x1], 1 }
 0x2d3   :  { %1279 = vsyncpa [#allocation10], 1 }
 0x2d4   :  { %1280 = vsyncpa [#allocation5], 1 }
 0x2d5   :  { %1282 = vsyncpa [#allocation5 + $0x1], 1 }

</bundles_post_ra>
